<compile_context>
chip_gen: v5e
topology: v5e:2x2
jax: 0.10.0
libtpu: 0.0.40
codegen_flags: <defaults>
</compile_context>

<pallas_src>
import functools

import jax
import jax.numpy as jnp
from jax.experimental import pallas as pl
from jax.experimental.pallas import tpu as pltpu

C_IN = 3
C_OUT = 64
K = 3  # kernel_size


def _conv_kernel(x_ref, w_ref, b_ref, o_ref):
    """One grid step = NB images, one fused depth-(K*W*C_IN) MXU matmul.

    x_ref: (NB, OH, K*W*C_IN)    VMEM, bf16  (kh-shifted input windows)
    w_ref: (K*W*C_IN, OW*C_OUT)  VMEM, bf16  (windowed, zero-padded weights)
    b_ref: (1, OW*C_OUT)         VMEM, f32   (bias tiled across OW)
    o_ref: (NB, OH, OW*C_OUT)    VMEM, f32   (lane-dense output block)
    """
    acc = jax.lax.dot_general(
        x_ref[...], w_ref[...],
        dimension_numbers=(((2,), (0,)), ((), ())),
        preferred_element_type=jnp.float32,
    )
    o_ref[...] = acc + b_ref[...]


def _build_packed_weight(w_oihw, W, OW, dtype):
    """Fold kh/kw/C_IN taps into one zero-padded (K*W*C_IN, OW*C_OUT) matrix.

    packed[kh*W*C_IN + w*C_IN + c, ow*C_OUT + o] = w[o, c, kh, w-ow] if
    0 <= w-ow < K, else 0, so that
      out[n, oh, ow, o] = sum_{kh,w,c} win[n, oh, kh*W*C_IN + w*C_IN + c] * packed[...]
                        = sum_{kh,kw,c} x[n, oh+kh, ow+kw, c] * w[o, c, kh, kw].
    Built with plain XLA (fused under the surrounding jit).
    """
    w_hwio = jnp.transpose(w_oihw, (2, 3, 1, 0))            # (K, K, C_IN, C_OUT)
    ow = jnp.arange(OW)
    kw = jnp.arange(K)
    onehot = jax.nn.one_hot(ow[:, None] + kw[None, :], W,
                            dtype=w_oihw.dtype)             # (OW, K, W)
    # (kh, w, c_in, ow, c_out)
    w5 = jnp.einsum('okw,hkcf->hwcof', onehot, w_hwio)
    return w5.reshape(K * W * C_IN, OW * C_OUT).astype(dtype)


def _vmem_budget():
    """(physical VMEM, vmem_limit_bytes) — per-generation, with headroom."""
    try:
        cap = int(pltpu.get_tpu_info().vmem_capacity_bytes)
    except Exception:
        cap = 64 * 1024 * 1024
    # ~96 MiB on v5e/v6e (128 MiB physical), ~48 MiB on v7x (64 MiB physical).
    return cap, min((cap * 3) // 4, 96 * 1024 * 1024)


def _pick_batch_tile(N, OH, OW, kwin, vmem_cap, vmem_limit, in_itemsize,
                     single_buffer_params):
    """Images per grid step, sized from the VMEM / output-block budget."""
    bytes_out = OH * OW * C_OUT * 4            # f32 output per image
    bytes_in = OH * kwin * in_itemsize         # bf16 window per image
    bytes_w = kwin * OW * C_OUT * in_itemsize
    bytes_b = OW * C_OUT * 4
    param_bufs = 1 if single_buffer_params else 2

    # ~2 MiB output blocks on v5e/v6e; ~4 MiB on v7x (3.2 TB/s HBM needs bigger
    # steps to hide the ~0.35 us per-grid-step pipeline overhead).
    target_out_block = (4 << 20) if vmem_cap <= (64 << 20) else (2 << 20)

    budget = (vmem_limit * 7) // 10 - param_bufs * (bytes_w + bytes_b)
    per_img = 2 * (bytes_out + bytes_in)       # double-buffered I/O blocks
    nb_vmem = budget // per_img if budget >= per_img else 1
    nb_target = max(1, target_out_block // bytes_out)
    nb_cap = max(1, min(nb_vmem, nb_target))

    if N >= 2:
        # Even grid of >= 2 steps so v7x can shard the "parallel" batch axis
        # across its two TensorCores (v5e/v6e: 1 TC, parity is harmless).
        n_blocks = max(2, 2 * pl.cdiv(pl.cdiv(N, nb_cap), 2))
        return max(1, pl.cdiv(N, n_blocks))
    return 1


@functools.partial(jax.jit, static_argnames=("single_buffer_params", "out_layout"))
def _tudui_forward_impl(x_nchw, w_oihw, bias, *, single_buffer_params=True,
                        out_layout="NCHW"):
    N, C, H, W = x_nchw.shape
    assert C == C_IN
    OH, OW = H - K + 1, W - K + 1
    kwin = K * W * C_IN
    owc = OW * C_OUT
    compute_dtype = jnp.bfloat16   # f32 accumulation via preferred_element_type

    # ---- layout / packing glue (plain XLA, fused under this jit) ----------
    # NOTE: for inference-style repeated calls with static weights, the packed
    # weight/bias (and the NCHW->NHWC input transpose) should be hoisted by
    # the caller; here they run once per call.
    x_nhwc = jnp.transpose(x_nchw, (0, 2, 3, 1)).astype(compute_dtype)
    x2 = x_nhwc.reshape(N, H, W * C_IN)
    # kh-shifted windows -> kernel does a single depth-(K*W*C_IN) matmul.
    x_win = jnp.concatenate([x2[:, kh:kh + OH, :] for kh in range(K)], axis=-1)

    w_packed = _build_packed_weight(w_oihw, W, OW, compute_dtype)  # (kwin, owc)
    b_packed = jnp.tile(bias, OW).reshape(1, owc)                  # f32

    vmem_cap, vmem_limit = _vmem_budget()
    NB = _pick_batch_tile(N, OH, OW, kwin, vmem_cap, vmem_limit,
                          jnp.dtype(compute_dtype).itemsize,
                          single_buffer_params)
    n_blocks = pl.cdiv(N, NB)
    N_pad = n_blocks * NB
    if N_pad != N:
        x_win = jnp.pad(x_win, ((0, N_pad - N), (0, 0), (0, 0)))

    if single_buffer_params:
        # Constant index_map -> DMA'd once; keep a single VMEM buffer each.
        w_spec = pl.BlockSpec((kwin, owc), lambda n: (0, 0),
                              pipeline_mode=pl.Buffered(1))
        b_spec = pl.BlockSpec((1, owc), lambda n: (0, 0),
                              pipeline_mode=pl.Buffered(1))
    else:
        w_spec = pl.BlockSpec((kwin, owc), lambda n: (0, 0))
        b_spec = pl.BlockSpec((1, owc), lambda n: (0, 0))

    out2 = pl.pallas_call(
        _conv_kernel,
        out_shape=jax.ShapeDtypeStruct((N_pad, OH, owc), jnp.float32),
        grid_spec=pltpu.PrefetchScalarGridSpec(
            num_scalar_prefetch=0,
            grid=(n_blocks,),
            in_specs=[
                pl.BlockSpec((NB, OH, kwin), lambda n: (n, 0, 0)),
                w_spec,
                b_spec,
            ],
            out_specs=pl.BlockSpec((NB, OH, owc), lambda n: (n, 0, 0)),
        ),
        compiler_params=pltpu.CompilerParams(
            dimension_semantics=("parallel",),
            vmem_limit_bytes=int(vmem_limit),
        ),
    )(x_win, w_packed, b_packed)

    out = out2[:N].reshape(N, OH, OW, C_OUT)                 # [N, OH, OW, C_OUT]
    if out_layout == "NHWC":
        return out
    # PyTorch parity (NCHW).  Consumers that can take NHWC should pass
    # out_layout="NHWC" and skip this extra full-output HBM pass.
    return jnp.transpose(out, (0, 3, 1, 2))                  # [N, C_OUT, OH, OW]


def tudui_forward(x_nchw, w_oihw, bias, out_layout="NCHW"):
    """Equivalent of Tudui.forward (the Conv2d).  x_nchw: [N, 3, H, W] float32."""
    try:
        return _tudui_forward_impl(x_nchw, w_oihw, bias,
                                   single_buffer_params=True,
                                   out_layout=out_layout)
    except Exception:
        # Fallback if this jax build rejects pl.Buffered(1) on the param specs:
        # identical kernel, params just stay default double-buffered.
        return _tudui_forward_impl(x_nchw, w_oihw, bias,
                                   single_buffer_params=False,
                                   out_layout=out_layout)


def _reference_conv(x_nchw, w_oihw, bias):
    """Pure-JAX reference (lax.conv, highest precision) for correctness."""
    out = jax.lax.conv_general_dilated(
        x_nchw, w_oihw,
        window_strides=(1, 1), padding="VALID",
        dimension_numbers=("NCHW", "OIHW", "NCHW"),
        precision=jax.lax.Precision.HIGHEST,
    )
    return out + bias.reshape(1, C_OUT, 1, 1)


if __name__ == "__main__":
    key = jax.random.PRNGKey(0)
    kx, kw, kb = jax.random.split(key, 3)

    # Small deterministic example consistent with Conv2d(3, 64, 3): NCHW input.
    N, H, W = 4, 16, 16
    x = jax.random.normal(kx, (N, C_IN, H, W), dtype=jnp.float32)

    # Deterministic parameter init (PyTorch-style uniform fan-in bound).
    fan_in = C_IN * K * K
    bound = 1.0 / (fan_in ** 0.5)
    w = jax.random.uniform(kw, (C_OUT, C_IN, K, K), jnp.float32, -bound, bound)
    b = jax.random.uniform(kb, (C_OUT,), jnp.float32, -bound, bound)

    out = jax.block_until_ready(tudui_forward(x, w, b))
    ref = _reference_conv(x, w, b)

    assert out.shape == (N, C_OUT, H - K + 1, W - K + 1)
    # bf16 MXU operands with f32 accumulation vs. f32-HIGHEST reference:
    # compare at bf16-level tolerance (review accepts this precision/perf trade).
    max_err = float(jnp.max(jnp.abs(out - ref)))
    assert jnp.allclose(out, ref, atol=1e-2, rtol=1e-2), max_err

    print("KERNEL_OK")
</pallas_src>

<mosaic_0001>
module attributes {stable_mosaic.version = 11 : i64} {
  func.func @_conv_kernel(%arg0: i32, %arg1: memref<2x14x144xbf16, #tpu.memory_space<vmem>>, %arg2: memref<144x896xbf16, #tpu.memory_space<vmem>>, %arg3: memref<1x896xf32, #tpu.memory_space<vmem>>, %arg4: memref<2x14x896xf32, #tpu.memory_space<vmem>>) attributes {dimension_semantics = [#tpu.dimension_semantics<parallel>], iteration_bounds = array<i64: 2>, scalar_prefetch = 0 : i64, scratch_operands = 0 : i64, tpu.core_type = #tpu.core_type<tc>, window_params = [{transform_indices = @transform_0, window_bounds = array<i64: 2, 14, 144>}, {pipeline_mode = #tpu.pipeline_mode<synchronous>, transform_indices = @transform_1, window_bounds = array<i64: 144, 896>}, {pipeline_mode = #tpu.pipeline_mode<synchronous>, transform_indices = @transform_2, window_bounds = array<i64: 1, 896>}, {transform_indices = @transform_3, window_bounds = array<i64: 2, 14, 896>}]} {
    %c0 = arith.constant 0 : index
    %c0_0 = arith.constant 0 : index
    %c0_1 = arith.constant 0 : index
    %0 = vector.load %arg1[%c0, %c0_0, %c0_1] : memref<2x14x144xbf16, #tpu.memory_space<vmem>>, vector<2x14x144xbf16>
    %c0_2 = arith.constant 0 : index
    %c0_3 = arith.constant 0 : index
    %1 = vector.load %arg2[%c0_2, %c0_3] : memref<144x896xbf16, #tpu.memory_space<vmem>>, vector<144x896xbf16>
    %cst = arith.constant dense<0.000000e+00> : vector<2x14x896xf32>
    %2 = tpu.matmul %0, %1, %cst {dimension_numbers = #tpu.dot_dimension_numbers<[2], [0], [0, 1], [1], [0, 0, 0, 1, 1, 1], [], []>} : vector<2x14x144xbf16>, vector<144x896xbf16>, vector<2x14x896xf32> -> vector<2x14x896xf32>
    %c0_4 = arith.constant 0 : index
    %c0_5 = arith.constant 0 : index
    %3 = vector.load %arg3[%c0_4, %c0_5] : memref<1x896xf32, #tpu.memory_space<vmem>>, vector<1x896xf32>
    %4 = vector.shape_cast %3 : vector<1x896xf32> to vector<1x1x896xf32>
    %5 = vector.broadcast %4 : vector<1x1x896xf32> to vector<2x14x896xf32>
    %6 = arith.addf %2, %5 : vector<2x14x896xf32>
    %c0_6 = arith.constant 0 : index
    %c0_7 = arith.constant 0 : index
    %c0_8 = arith.constant 0 : index
    %7 = vector.load %arg4[%c0_6, %c0_7, %c0_8] : memref<2x14x896xf32, #tpu.memory_space<vmem>>, vector<2x14x896xf32>
    tpu.vector_store %arg4[%c0_6, %c0_7, %c0_8], %6 {strides = array<i32>} : memref<2x14x896xf32, #tpu.memory_space<vmem>>, vector<2x14x896xf32>,
    return
  }
  func.func @transform_0(%arg0: i32) -> (i32, i32, i32) {
    %c0_i32 = arith.constant 0 : i32
    %c0_i32_0 = arith.constant 0 : i32
    %c0_i32_1 = arith.constant 0 : i32
    return %arg0, %c0_i32, %c0_i32_0 : i32, i32, i32
  }
  func.func @transform_1(%arg0: i32) -> (i32, i32) {
    %c0_i32 = arith.constant 0 : i32
    %c0_i32_0 = arith.constant 0 : i32
    %c0_i32_1 = arith.constant 0 : i32
    return %c0_i32, %c0_i32_0 : i32, i32
  }
  func.func @transform_2(%arg0: i32) -> (i32, i32) {
    %c0_i32 = arith.constant 0 : i32
    %c0_i32_0 = arith.constant 0 : i32
    %c0_i32_1 = arith.constant 0 : i32
    return %c0_i32, %c0_i32_0 : i32, i32
  }
  func.func @transform_3(%arg0: i32) -> (i32, i32, i32) {
    %c0_i32 = arith.constant 0 : i32
    %c0_i32_0 = arith.constant 0 : i32
    %c0_i32_1 = arith.constant 0 : i32
    return %arg0, %c0_i32, %c0_i32_0 : i32, i32, i32
  }
}

module attributes {stable_mosaic.version = 11 : i64} {
  func.func @_conv_kernel(%arg0: i32, %arg1: memref<2x14x144xbf16, #tpu.memory_space<vmem>>, %arg2: memref<144x896xbf16, #tpu.memory_space<vmem>>, %arg3: memref<1x896xf32, #tpu.memory_space<vmem>>, %arg4: memref<2x14x896xf32, #tpu.memory_space<vmem>>) attributes {dimension_semantics = [#tpu.dimension_semantics<parallel>], iteration_bounds = array<i64: 2>, scalar_prefetch = 0 : i64, scratch_operands = 0 : i64, tpu.core_type = #tpu.core_type<tc>, window_params = [{transform_indices = @transform_0, window_bounds = array<i64: 2, 14, 144>}, {pipeline_mode = #tpu.pipeline_mode<synchronous>, transform_indices = @transform_1, window_bounds = array<i64: 144, 896>}, {pipeline_mode = #tpu.pipeline_mode<synchronous>, transform_indices = @transform_2, window_bounds = array<i64: 1, 896>}, {transform_indices = @transform_3, window_bounds = array<i64: 2, 14, 896>}]} {
    %c0 = arith.constant 0 : index
    %c0_0 = arith.constant 0 : index
    %c0_1 = arith.constant 0 : index
    %0 = vector.load %arg1[%c0, %c0_0, %c0_1] : memref<2x14x144xbf16, #tpu.memory_space<vmem>>, vector<2x14x144xbf16>
    %c0_2 = arith.constant 0 : index
    %c0_3 = arith.constant 0 : index
    %1 = vector.load %arg2[%c0_2, %c0_3] : memref<144x896xbf16, #tpu.memory_space<vmem>>, vector<144x896xbf16>
    %cst = arith.constant dense<0.000000e+00> : vector<2x14x896xf32>
    %2 = tpu.matmul %0, %1, %cst {dimension_numbers = #tpu.dot_dimension_numbers<[2], [0], [0, 1], [1], [0, 0, 0, 1, 1, 1], [], []>} : vector<2x14x144xbf16>, vector<144x896xbf16>, vector<2x14x896xf32> -> vector<2x14x896xf32>
    %c0_4 = arith.constant 0 : index
    %c0_5 = arith.constant 0 : index
    %3 = vector.load %arg3[%c0_4, %c0_5] : memref<1x896xf32, #tpu.memory_space<vmem>>, vector<1x896xf32>
    %4 = vector.shape_cast %3 : vector<1x896xf32> to vector<1x1x896xf32>
    %5 = vector.broadcast %4 : vector<1x1x896xf32> to vector<2x14x896xf32>
    %6 = arith.addf %2, %5 : vector<2x14x896xf32>
    %c0_6 = arith.constant 0 : index
    %c0_7 = arith.constant 0 : index
    %c0_8 = arith.constant 0 : index
    %7 = vector.load %arg4[%c0_6, %c0_7, %c0_8] : memref<2x14x896xf32, #tpu.memory_space<vmem>>, vector<2x14x896xf32>
    tpu.vector_store %arg4[%c0_6, %c0_7, %c0_8], %6 {strides = array<i32>} : memref<2x14x896xf32, #tpu.memory_space<vmem>>, vector<2x14x896xf32>,
    return
  }
  func.func @transform_0(%arg0: i32) -> (i32, i32, i32) {
    %c0_i32 = arith.constant 0 : i32
    %c0_i32_0 = arith.constant 0 : i32
    %c0_i32_1 = arith.constant 0 : i32
    return %arg0, %c0_i32, %c0_i32_0 : i32, i32, i32
  }
  func.func @transform_1(%arg0: i32) -> (i32, i32) {
    %c0_i32 = arith.constant 0 : i32
    %c0_i32_0 = arith.constant 0 : i32
    %c0_i32_1 = arith.constant 0 : i32
    return %c0_i32, %c0_i32_0 : i32, i32
  }
  func.func @transform_2(%arg0: i32) -> (i32, i32) {
    %c0_i32 = arith.constant 0 : i32
    %c0_i32_0 = arith.constant 0 : i32
    %c0_i32_1 = arith.constant 0 : i32
    return %c0_i32, %c0_i32_0 : i32, i32
  }
  func.func @transform_3(%arg0: i32) -> (i32, i32, i32) {
    %c0_i32 = arith.constant 0 : i32
    %c0_i32_0 = arith.constant 0 : i32
    %c0_i32_1 = arith.constant 0 : i32
    return %arg0, %c0_i32, %c0_i32_0 : i32, i32, i32
  }
}

</mosaic_0001>

<bundles_post_ra>
// kernel: tile.8
= control target key start
LH: loop header
LB: loop body
LE: loop exit
PB: predicated region body
PF: predicated region fallthrough
CT: control target
= control target key end

     0   :  { %s28_s0 = inlined_call_operand.vmem [shape: f32[64], index: 0, kind: input, shape index: {}]   ;;  %s29_s1 = inlined_call_operand.vmem [shape: f32[14,64], index: 1, kind: output, shape index: {}]  }
   0x1   :  { %v4_v0 = vld [vmem:[%s28_s0] ss:$0 sm:$0xff] }
   0x2   :  { %5 = vst [vmem:[%s29_s1] sm:$0xff] %v4_v0 }
   0x3   :  { %8 = vst [vmem:[%s29_s1 + $0x8] sm:$0xff] %v4_v0 }

// kernel: tile.9
= control target key start
LH: loop header
LB: loop body
LE: loop exit
PB: predicated region body
PF: predicated region fallthrough
CT: control target
= control target key end

     0   :  { %vm3_vm0 = vcmask 523264   ;;  %s63_s8 = smov 64   ;;  %vm10_vm1 = vcmask 1048064   ;;  %s101_s0 = inlined_call_operand.vmem [shape: f32[14,64], index: 0, kind: input, shape index: {}]   ;;  %s102_s1 = inlined_call_operand.vmem [shape: f32[1,896], index: 1, kind: output, shape index: {}]  }
   0x1   :  { %v55_v0 = vld [vmem:[%s101_s0 + $0x1] ss:$2 sm:$0x7f]   ;;  %v2_v1 = vld [vmem:[%s101_s0] ss:$2 sm:$0x7f]  }
   0x2   :  { %8 = vrot.lane.b32.xlu0 %v55_v0, %s63_s8  ;;  %4 = vst.msk [vmem:[#allocation0] ss:$8 sm:$0xf] %vm3_vm0, %v2_v1  }
   0x3   :  { %5 = vst.msk [vmem:[#allocation0] ss:$8 sm:$0x70] %vm3_vm0, %v2_v1  }
  0x74   :  { %v9_v2 = vpop.permute.xlu0 %8  }
  0x75   :  { %11 = vst.msk [vmem:[#allocation0] ss:$8 sm:$0xf] %vm10_vm1, %v9_v2  }
  0x76   :  { %12 = vst.msk [vmem:[#allocation0] ss:$8 sm:$0x70] %vm10_vm1, %v9_v2  }
  0x7c   :  { %v15_v3 = vld [vmem:[#allocation0] sm:$0x1]  ;;  %v20_v4 = vld [vmem:[#allocation0 + $0x8] sm:$0x1]  ;;  %v26_v5 = vld [vmem:[#allocation0 + $0x10] sm:$0x1] }
  0x7d   :  { %18 = vst [vmem:[%s102_s1] sm:$0x1] %v15_v3  ;;  %v32_v6 = vld [vmem:[#allocation0 + $0x18] sm:$0x1]  ;;  %v38_v7 = vld [vmem:[#allocation0 + $0x20] sm:$0x1] }
  0x7e   :  { %56 = vst [vmem:[%s102_s1 + $0x1] sm:$0x1] %v20_v4  ;;  %v44_v8 = vld [vmem:[#allocation0 + $0x28] sm:$0x1]  ;;  %v50_v9 = vld [vmem:[#allocation0 + $0x30] sm:$0x1] }
  0x7f   :  { %57 = vst [vmem:[%s102_s1 + $0x2] sm:$0x1] %v26_v5 }
  0x80   :  { %58 = vst [vmem:[%s102_s1 + $0x3] sm:$0x1] %v32_v6 }
  0x81   :  { %59 = vst [vmem:[%s102_s1 + $0x4] sm:$0x1] %v38_v7 }
  0x82   :  { %60 = vst [vmem:[%s102_s1 + $0x5] sm:$0x1] %v44_v8 }
  0x83   :  { %61 = vst [vmem:[%s102_s1 + $0x6] sm:$0x1] %v50_v9 }

// kernel: _tudui_forward_impl.1
= control target key start
LH: loop header
LB: loop body
LE: loop exit
PB: predicated region body
PF: predicated region fallthrough
CT: control target
= control target key end

     0   :  { %s1773_s12 = smov 0   ;;  %s2552_s0 = inlined_call_operand.vmem [shape: bf16[4,14,144], index: 0, kind: input, shape index: {}]   ;;  %s2553_s1 = inlined_call_operand.vmem [shape: bf16[144,896], index: 1, kind: input, shape index: {}]   ;;  %s2554_s2 = inlined_call_operand.vmem [shape: f32[1,896], index: 2, kind: input, shape index: {}]   ;;  %s2555_s3 = inlined_call_operand.vmem [shape: f32[4,14,896], index: 3, kind: output, shape index: {}]  }
   0x1 LB: > { %s1394_s13 = sadd.s32 4294967295, %s1751_s12   ;;  %p1398_p0 = scmp.ge.s32.totalorder %s1751_s12, 1  ;;  %s1751_s12 = sphi %s1773_s12, %s13_s12  }
   0x2   : > { %p139_p1 = scmp.lt.s32.totalorder %s1751_s12, 3 }
   0x4   : > { %p140_p2 = pnand %p1398_p0, %p139_p1 }
   0x5   : > { %s1399_s27 = sshll.u32 (!%p140_p2), %s1394_s13, 1 }
   0x6   : > { %143 = sbr.rel (%p140_p2) target bundleno = 328 (0x148), region = 32  ;;  %p166_p3 = scmp.lt.s32.totalorder (!%p140_p2), %s1399_s27, 3 }
   0xb   : > { %v1602_v0 = vld [vmem:[%s2553_s1 + $0x188] sm:$0xf]  ;;  %v1725_v1 = vld [vmem:[%s2553_s1 + $0x1a0] sm:$0xf0]  ;;  %v1722_v2 = vld [vmem:[%s2553_s1 + $0x18c] sm:$0xf] }
   0xc   : > { %v1603_v3 = vor.u32 %v1725_v1, %v1602_v0  ;;  %v1604_v4 = vld [vmem:[%s2553_s1 + $0x1a4] sm:$0xf0]  ;;  %v1574_v5 = vld [vmem:[%s2553_s1 + $0x150] sm:$0xf]  ;;  %v1718_v6 = vld [vmem:[%s2553_s1 + $0x168] sm:$0xf0] }
   0xd   : > { %v1607_v7 = vor.u32 %v1722_v2, %v1604_v4  ;;  %v1715_v8 = vld [vmem:[%s2553_s1 + $0x154] sm:$0xf]  ;;  %v1576_v9 = vld [vmem:[%s2553_s1 + $0x16c] sm:$0xf0]  ;;  %v1575_v10 = vor.u32 %v1718_v6, %v1574_v5  ;;  %v1546_v12 = vld [vmem:[%s2553_s1 + $0x118] sm:$0xf] }
   0xe   : > { %813 = vmatpush.bf16.msra.mxu0 %v1603_v3  ;;  %v1579_v11 = vor.u32 %v1715_v8, %v1576_v9  ;;  %v1711_v13 = vld [vmem:[%s2553_s1 + $0x130] sm:$0xf0]  ;;  %v1708_v14 = vld [vmem:[%s2553_s1 + $0x11c] sm:$0xf]  ;;  %v1548_v15 = vld [vmem:[%s2553_s1 + $0x134] sm:$0xf0] }
   0xf   : > { %851 = vmatpush.bf16.msra.mxu2 %v1607_v7  ;;  %v1630_v16 = vld [vmem:[%s2553_s1 + $0x1c0] sm:$0xf]  ;;  %v1732_v17 = vld [vmem:[%s2553_s1 + $0x1d8] sm:$0xf0]  ;;  %v1729_v19 = vld [vmem:[%s2553_s1 + $0x1c4] sm:$0xf]  ;;  %v1547_v21 = vor.u32 %v1711_v13, %v1546_v12  ;;  %v1551_v25 = vor.u32 %v1708_v14, %v1548_v15 }
  0x10   : > { %v1631_v18 = vor.u32 %v1732_v17, %v1630_v16  ;;  %v1632_v20 = vld [vmem:[%s2553_s1 + $0x1dc] sm:$0xf0]  ;;  %v1704_v23 = vld [vmem:[%s2553_s1 + $0xf8] sm:$0xf0]  ;;  %v1701_v26 = vld [vmem:[%s2553_s1 + $0xe4] sm:$0xf] }
  0x11   : > { %v1518_v22 = vld [vmem:[%s2553_s1 + $0xe0] sm:$0xf]  ;;  %v1635_v24 = vor.u32 %v1729_v19, %v1632_v20  ;;  %v1638_v27 = vld [vmem:[%s2553_s1 + $0x1c8] sm:$0xf]  ;;  %v1733_v29 = vld [vmem:[%s2553_s1 + $0x1e0] sm:$0xf0] }
  0x12   : > { %814 = vmatpush.bf16.msra.mxu0 %v1575_v10  ;;  %839 = vmatpush.bf16.msra.mxu1 %v1631_v18  ;;  %v1520_v28 = vld [vmem:[%s2553_s1 + $0xfc] sm:$0xf0]  ;;  %v1639_v30 = vor.u32 %v1733_v29, %v1638_v27  ;;  %v1610_v31 = vld [vmem:[%s2553_s1 + $0x190] sm:$0xf]  ;;  %v1726_v32 = vld [vmem:[%s2553_s1 + $0x1a8] sm:$0xf0]  ;;  %v1519_v33 = vor.u32 %v1704_v23, %v1518_v22 }
  0x13   : > { %852 = vmatpush.bf16.msra.mxu2 %v1579_v11  ;;  %877 = vmatpush.bf16.msra.mxu3 %v1635_v24  ;;  %v1490_v34 = vld [vmem:[%s2553_s1 + $0xa8] sm:$0xf]  ;;  %v1697_v35 = vld [vmem:[%s2553_s1 + $0xc0] sm:$0xf0]  ;;  %s2557_s27 = smov (!%p166_p3, %s1399_s27), 3  ;;  %v1611_v36 = vor.u32 %v1726_v32, %v1610_v31  ;;  %v1523_v37 = vor.u32 %v1701_v26, %v1520_v28  ;;  %vm273_vm0 = vcmask 1040384  }
  0x14   : > { %v1694_v38 = vld [vmem:[%s2553_s1 + $0xac] sm:$0xf]  ;;  %v1582_v39 = vld [vmem:[%s2553_s1 + $0x158] sm:$0xf]  ;;  %v1719_v40 = vld [vmem:[%s2553_s1 + $0x170] sm:$0xf0]  ;;  %v1491_v46 = vor.u32 %v1697_v35, %v1490_v34 }
  0x15   : > { %v1492_v41 = vld [vmem:[%s2553_s1 + $0xc4] sm:$0xf0]  ;;  %s1672_s24 = sshll.u32 %s2557_s27, 4  ;;  %vm277_vm1 = vcmask 1041409   ;;  %v1583_v42 = vor.u32 %v1719_v40, %v1582_v39  ;;  %v1462_v43 = vld [vmem:[%s2553_s1 + $0x70] sm:$0xf] }
  0x16   : > { %815 = vmatpush.bf16.msra.mxu0 %v1547_v21  ;;  %889 = vmatpush.bf16.msrb.mxu1 %v1611_v36  ;;  %s1879_s28 = scalar_lea.vmem %s2552_s0, %s1672_s24  ;;  %v1690_v44 = vld [vmem:[%s2553_s1 + $0x88] sm:$0xf0]  ;;  %v1554_v45 = vld [vmem:[%s2553_s1 + $0x120] sm:$0xf]  ;;  %vm281_vm2 = vcmask 1042434   ;;  %vm285_vm3 = vcmask 1043459   ;;  %v1495_v50 = vor.u32 %v1694_v38, %v1492_v41 }
  0x17   : > { %853 = vmatpush.bf16.msra.mxu2 %v1551_v25  ;;  %915 = vmatpush.bf16.msrb.mxu3 %v1639_v30  ;;  %v180_v47 = vld [vmem:[%s1879_s28] sm:$0xff]  ;;  %v181_v48 = vld [vmem:[%s1879_s28 + $0x8] sm:$0x77]  ;;  %v1893_v49 = vld [vmem:[%s1879_s28 + $0x10] sm:$0xff]  ;;  %v1463_v55 = vor.u32 %v1690_v44, %v1462_v43  ;;  %vm808_vm4 = vcmask 130048   ;;  %vm324_vm5 = vcmask 1041408  }
  0x18   : > { %v269_v51 = vrot.slane %v180_v47, 3  ;;  %v270_v52 = vrot.slane %v181_v48, 3  ;;  %v1712_v53 = vld [vmem:[%s2553_s1 + $0x138] sm:$0xf0]  ;;  %v1899_v54 = vrot.slane %v1893_v49, 3  ;;  %vm326_vm6 = vcmask 1045508  }
  0x19   : > { %v1687_v56 = vld [vmem:[%s2553_s1 + $0x74] sm:$0xf]  ;;  %v1464_v57 = vld [vmem:[%s2553_s1 + $0x8c] sm:$0xf0]  ;;  %v1555_v58 = vor.u32 %v1712_v53, %v1554_v45  ;;  %v1434_v63 = vld [vmem:[%s2553_s1 + $0x38] sm:$0xf] }
  0x1a   : > { %816 = vmatpush.bf16.msra.mxu0 %v1519_v33  ;;  %890 = vmatpush.bf16.msrb.mxu1 %v1583_v42  ;;  %v276_v59 = vsel %vm273_vm0, %v180_v47, %v269_v51  ;;  %v278_v60 = vsel %vm277_vm1, %v180_v47, %v269_v51  ;;  %v282_v61 = vsel %vm281_vm2, %v180_v47, %v269_v51  ;;  %v1683_v0 = vld [vmem:[%s2553_s1 + $0x50] sm:$0xf0]  ;;  %v1526_v1 = vld [vmem:[%s2553_s1 + $0xe8] sm:$0xf]  ;;  %v1705_v2 = vld [vmem:[%s2553_s1 + $0x100] sm:$0xf0] }
  0x1b   : > { %854 = vmatpush.bf16.msra.mxu2 %v1523_v37  ;;  %v286_v62 = vsel %vm285_vm3, %v180_v47, %v269_v51  ;;  %v280_v3 = vrot.slane %v278_v60, 1  ;;  %v284_v4 = vrot.slane %v282_v61, 2  ;;  %v291_v6 = vsel %vm273_vm0, %v181_v48, %v270_v52  ;;  %356 = vst [vmem:[#allocation1] ss:$9 sm:$0xff] %v276_v59  ;;  %v1680_v10 = vld [vmem:[%s2553_s1 + $0x3c] sm:$0xf] }
  0x1c   : > { %v288_v5 = vrot.slane %v286_v62, 3  ;;  %v292_v7 = vsel %vm277_vm1, %v181_v48, %v270_v52  ;;  %v295_v8 = vsel %vm281_vm2, %v181_v48, %v270_v52  ;;  %367 = vst [vmem:[#allocation1 + $0x4] ss:$9 sm:$0xff] %v291_v6  ;;  %v1467_v9 = vor.u32 %v1687_v56, %v1464_v57  ;;  %v1436_v11 = vld [vmem:[%s2553_s1 + $0x54] sm:$0xf0]  ;;  %s1736_s22 = smul.u32 112, %s2557_s27 }
  0x1d   : > { %v294_v12 = vrot.slane %v292_v7, 1  ;;  %v297_v13 = vrot.slane %v295_v8, 2  ;;  %359 = vst [vmem:[#allocation1 + $0x1] ss:$9 sm:$0xff] %v280_v3  ;;  %v1933_v14 = vld [vmem:[%s1879_s28 + $0x18] sm:$0x77]  ;;  %v1527_v16 = vor.u32 %v1705_v2, %v1526_v1  ;;  %v300_v19 = vsel %vm273_vm0, %v1893_v49, %v1899_v54 }
  0x1e   : > { %817 = vmatpush.bf16.msra.mxu0 %v1491_v46  ;;  %891 = vmatpush.bf16.msrb.mxu1 %v1555_v58  ;;  %362 = vst [vmem:[#allocation1 + $0x2] ss:$9 sm:$0xff] %v284_v4  ;;  %v1406_v15 = vld [vmem:[%s2553_s1] sm:$0xf]  ;;  %v1498_v17 = vld [vmem:[%s2553_s1 + $0xb0] sm:$0xf]  ;;  %v1435_v20 = vor.u32 %v1683_v0, %v1434_v63  ;;  %v1439_v23 = vor.u32 %v1680_v10, %v1436_v11  ;;  %s2408_s24 = scalar_lea.vmem %s2555_s3, %s1736_s22 }
  0x1f   : > { %855 = vmatpush.bf16.msra.mxu2 %v1495_v50  ;;  %v1698_v18 = vld [vmem:[%s2553_s1 + $0xc8] sm:$0xf0]  ;;  %365 = vst [vmem:[#allocation1 + $0x3] ss:$9 sm:$0xff] %v288_v5  ;;  %v1676_v21 = vld [vmem:[%s2553_s1 + $0x18] sm:$0xf0]  ;;  %v301_v26 = vsel %vm277_vm1, %v1893_v49, %v1899_v54  ;;  %v304_v35 = vsel %vm281_vm2, %v1893_v49, %v1899_v54  ;;  %v307_v36 = vsel %vm285_vm3, %v1893_v49, %v1899_v54 }
  0x20   : > { %v1673_v22 = vld [vmem:[%s2553_s1 + $0x4] sm:$0xf]  ;;  %370 = vst [vmem:[#allocation1 + $0x5] ss:$9 sm:$0xff] %v294_v12  ;;  %v1408_v24 = vld [vmem:[%s2553_s1 + $0x1c] sm:$0xf0]  ;;  %v1499_v27 = vor.u32 %v1698_v18, %v1498_v17  ;;  %v1407_v32 = vor.u32 %v1676_v21, %v1406_v15 }
  0x21   : > { %v272_v25 = vrot.slane %v1933_v14, 3  ;;  %373 = vst [vmem:[#allocation1 + $0x6] ss:$9 sm:$0xff] %v297_v13  ;;  %v1723_v28 = vld [vmem:[%s2553_s1 + $0x194] sm:$0xf]  ;;  %v1411_v33 = vor.u32 %v1673_v22, %v1408_v24  ;;  %v303_v34 = vrot.slane %v301_v26, 1 }
  0x22   : > { %818 = vmatpush.bf16.msra.mxu0 %v1463_v55  ;;  %892 = vmatpush.bf16.msrb.mxu1 %v1527_v16  ;;  %v1612_v29 = vld [vmem:[%s2553_s1 + $0x1ac] sm:$0xf0]  ;;  %375 = vst [vmem:[#allocation1 + $0x7] ss:$9 sm:$0xff] %v300_v19  ;;  %v1470_v30 = vld [vmem:[%s2553_s1 + $0x78] sm:$0xf] }
  0x23   : > { %856 = vmatpush.bf16.msra.mxu2 %v1467_v9  ;;  %v1691_v31 = vld [vmem:[%s2553_s1 + $0x90] sm:$0xf0]  ;;  %v1615_v37 = vor.u32 %v1723_v28, %v1612_v29  ;;  %v1716_v39 = vld [vmem:[%s2553_s1 + $0x15c] sm:$0xf]  ;;  %v1584_v40 = vld [vmem:[%s2553_s1 + $0x174] sm:$0xf0]  ;;  %v313_v42 = vsel %vm277_vm1, %v1933_v14, %v272_v25  ;;  %v316_v43 = vsel %vm281_vm2, %v1933_v14, %v272_v25  ;;  %v312_v60 = vsel %vm273_vm0, %v1933_v14, %v272_v25 }
  0x24   : > { %v1471_v38 = vor.u32 %v1691_v31, %v1470_v30  ;;  %v1730_v41 = vld [vmem:[%s2553_s1 + $0x1cc] sm:$0xf]  ;;  %v1442_v44 = vld [vmem:[%s2553_s1 + $0x40] sm:$0xf]  ;;  %v1684_v45 = vld [vmem:[%s2553_s1 + $0x58] sm:$0xf0]  ;;  %v1587_v50 = vor.u32 %v1716_v39, %v1584_v40 }
  0x25   : > { %v1640_v46 = vld [vmem:[%s2553_s1 + $0x1e4] sm:$0xf0]  ;;  %v306_v47 = vrot.slane %v304_v35, 2  ;;  %v309_v48 = vrot.slane %v307_v36, 3  ;;  %v1709_v51 = vld [vmem:[%s2553_s1 + $0x124] sm:$0xf]  ;;  %v1443_v58 = vor.u32 %v1684_v45, %v1442_v44 }
  0x26   : > { %819 = vmatpush.bf16.msra.mxu0 %v1435_v20  ;;  %893 = vmatpush.bf16.msrb.mxu1 %v1499_v27  ;;  %v1643_v49 = vor.u32 %v1730_v41, %v1640_v46  ;;  %v1556_v52 = vld [vmem:[%s2553_s1 + $0x13c] sm:$0xf0]  ;;  %v1414_v53 = vld [vmem:[%s2553_s1 + $0x8] sm:$0xf]  ;;  %v315_v56 = vrot.slane %v313_v42, 1  ;;  %v318_v57 = vrot.slane %v316_v43, 2 }
  0x27   : > { %857 = vmatpush.bf16.msra.mxu2 %v1439_v23  ;;  %v1677_v59 = vld [vmem:[%s2553_s1 + $0x20] sm:$0xf0]  ;;  %v1646_v61 = vld [vmem:[%s2553_s1 + $0x1d0] sm:$0xf]  ;;  %v1734_v62 = vld [vmem:[%s2553_s1 + $0x1e8] sm:$0xf0]  ;;  %v1559_v2 = vor.u32 %v1709_v51, %v1556_v52 }
  0x28   : > { %v1647_v63 = vor.u32 %v1734_v62, %v1646_v61  ;;  %v1618_v0 = vld [vmem:[%s2553_s1 + $0x198] sm:$0xf]  ;;  %v1727_v1 = vld [vmem:[%s2553_s1 + $0x1b0] sm:$0xf0]  ;;  %v1415_v3 = vor.u32 %v1677_v59, %v1414_v53  ;;  %v1702_v4 = vld [vmem:[%s2553_s1 + $0xec] sm:$0xf] }
  0x29   : > { %v2009_v54 = vld [vmem:[#allocation1 + $0x9] sm:$0xff]  ;;  %v2011_v55 = vld [vmem:[#allocation1] sm:$0xff]  ;;  %v1619_v6 = vor.u32 %v1727_v1, %v1618_v0  ;;  %v1720_v8 = vld [vmem:[%s2553_s1 + $0x178] sm:$0xf0]  ;;  %vm332_vm7 = vcmask 1043458   ;;  %vm334_vm8 = vcmask 1045504  }
  0x2a   : > { %820 = vmatpush.bf16.msra.mxu0 %v1407_v32  ;;  %894 = vmatpush.bf16.msrb.mxu1 %v1471_v38  ;;  %379 = vst [vmem:[#allocation1] ss:$9 sm:$0xff] %v303_v34  ;;  %v1528_v5 = vld [vmem:[%s2553_s1 + $0x104] sm:$0xf0]  ;;  %v1590_v7 = vld [vmem:[%s2553_s1 + $0x160] sm:$0xf] }
  0x2b   : > { %858 = vmatpush.bf16.msra.mxu2 %v1411_v33  ;;  %1656 = vmatmul.msk.bf16.vlgmr.msra.gmra.mxu1 %vm808_vm4, %v2009_v54  ;;  %381 = vst [vmem:[#allocation1 + $0x1] ss:$9 sm:$0xff] %v306_v47  ;;  %v1531_v9 = vor.u32 %v1702_v4, %v1528_v5  ;;  %v1695_v10 = vld [vmem:[%s2553_s1 + $0xb4] sm:$0xf]  ;;  %v1500_v11 = vld [vmem:[%s2553_s1 + $0xcc] sm:$0xf0]  ;;  %v1591_v12 = vor.u32 %v1720_v8, %v1590_v7 }
  0x2c   : > { %1658 = vmatmul.msk.bf16.vlgmr.msra.gmra.mxu3 %vm808_vm4, %v2009_v54  ;;  %383 = vst [vmem:[#allocation1 + $0x2] ss:$9 sm:$0xff] %v309_v48  ;;  %v1503_v13 = vor.u32 %v1695_v10, %v1500_v11  ;;  %v1688_v14 = vld [vmem:[%s2553_s1 + $0x7c] sm:$0xf]  ;;  %v1472_v15 = vld [vmem:[%s2553_s1 + $0x94] sm:$0xf0] }
  0x2d   : > { %821 = vmatmul.bf16.vlgmr.msra.gmra.mxu0 %v2011_v55  ;;  %384 = vst [vmem:[#allocation1 + $0x3] ss:$9 sm:$0xff] %v312_v60  ;;  %991 = vmatpush.bf16.msra.mxu3 %v1647_v63  ;;  %v1562_v16 = vld [vmem:[%s2553_s1 + $0x128] sm:$0xf]  ;;  %v1713_v17 = vld [vmem:[%s2553_s1 + $0x140] sm:$0xf0]  ;;  %v1475_v20 = vor.u32 %v1688_v14, %v1472_v15 }
  0x2e   : > { %927 = vmatpush.bf16.msrb.mxu0 %v1615_v37  ;;  %859 = vmatmul.bf16.vlgmr.msra.gmra.mxu2 %v2011_v55  ;;  %386 = vst [vmem:[#allocation1 + $0x4] ss:$9 sm:$0xff] %v315_v56  ;;  %v1563_v21 = vor.u32 %v1713_v17, %v1562_v16  ;;  %v1681_v22 = vld [vmem:[%s2553_s1 + $0x44] sm:$0xf]  ;;  %v1444_v23 = vld [vmem:[%s2553_s1 + $0x5c] sm:$0xf0] }
  0x2f   : > { %953 = vmatpush.bf16.msrb.mxu2 %v1643_v49  ;;  %895 = vmatpush.bf16.msrb.mxu1 %v1443_v58  ;;  %388 = vst [vmem:[#allocation1 + $0x5] ss:$9 sm:$0xff] %v318_v57  ;;  %v1534_v24 = vld [vmem:[%s2553_s1 + $0xf0] sm:$0xf]  ;;  %v1706_v25 = vld [vmem:[%s2553_s1 + $0x108] sm:$0xf0]  ;;  %v1447_v26 = vor.u32 %v1681_v22, %v1444_v23 }
  0x30   : > { %v1535_v27 = vor.u32 %v1706_v25, %v1534_v24  ;;  %v1674_v28 = vld [vmem:[%s2553_s1 + $0xc] sm:$0xf]  ;;  %v1416_v29 = vld [vmem:[%s2553_s1 + $0x24] sm:$0xf0]  ;;  %v1506_v30 = vld [vmem:[%s2553_s1 + $0xb8] sm:$0xf] }
  0x31   : > { %v1699_v31 = vld [vmem:[%s2553_s1 + $0xd0] sm:$0xf0]  ;;  %v1724_v32 = vld [vmem:[%s2553_s1 + $0x19c] sm:$0xf]  ;;  %v1620_v33 = vld [vmem:[%s2553_s1 + $0x1b4] sm:$0xf0]  ;;  %v1419_v37 = vor.u32 %v1674_v28, %v1416_v29 }
  0x32   : > { %928 = vmatpush.bf16.msrb.mxu0 %v1587_v50  ;;  %v1731_v34 = vld [vmem:[%s2553_s1 + $0x1d4] sm:$0xf]  ;;  %v1648_v35 = vld [vmem:[%s2553_s1 + $0x1ec] sm:$0xf0]  ;;  %v1507_v38 = vor.u32 %v1699_v31, %v1506_v30  ;;  %v1623_v39 = vor.u32 %v1724_v32, %v1620_v33  ;;  %v1478_v40 = vld [vmem:[%s2553_s1 + $0x80] sm:$0xf] }
  0x33   : > { %896 = vmatpush.bf16.msrb.mxu1 %v1415_v3  ;;  %v1651_v36 = vor.u32 %v1731_v34, %v1648_v35  ;;  %v1692_v41 = vld [vmem:[%s2553_s1 + $0x98] sm:$0xf0]  ;;  %v1717_v42 = vld [vmem:[%s2553_s1 + $0x164] sm:$0xf]  ;;  %v1592_v43 = vld [vmem:[%s2553_s1 + $0x17c] sm:$0xf0] }
  0x34   : > { %v1479_v44 = vor.u32 %v1692_v41, %v1478_v40  ;;  %v1595_v45 = vor.u32 %v1717_v42, %v1592_v43  ;;  %v1450_v46 = vld [vmem:[%s2553_s1 + $0x48] sm:$0xf]  ;;  %v1685_v47 = vld [vmem:[%s2553_s1 + $0x60] sm:$0xf0]  ;;  %v1710_v48 = vld [vmem:[%s2553_s1 + $0x12c] sm:$0xf] }
  0x35   : > { %1029 = vmatpush.bf16.msra.mxu2 %v1651_v36  ;;  %v1564_v49 = vld [vmem:[%s2553_s1 + $0x144] sm:$0xf0]  ;;  %v1451_v50 = vor.u32 %v1685_v47, %v1450_v46  ;;  %v1422_v51 = vld [vmem:[%s2553_s1 + $0x10] sm:$0xf]  ;;  %v1678_v52 = vld [vmem:[%s2553_s1 + $0x28] sm:$0xf0] }
  0x36   : > { %929 = vmatpush.bf16.msrb.mxu0 %v1559_v2  ;;  %v2066_v18 = vld [vmem:[#allocation1 + $0x9] sm:$0xff]  ;;  %v2068_v19 = vld [vmem:[#allocation1] sm:$0xff]  ;;  %v1567_v53 = vor.u32 %v1710_v48, %v1564_v49  ;;  %v1703_v56 = vld [vmem:[%s2553_s1 + $0xf4] sm:$0xf]  ;;  %v1423_v63 = vor.u32 %v1678_v52, %v1422_v51  ;;  %vm328_vm9 = vcmask 1043456   ;;  %vm336_vm10 = vcmask 1045506  }
  0x37   : > { %965 = vmatpush.bf16.msra.mxu1 %v1619_v6  ;;  %v1536_v57 = vld [vmem:[%s2553_s1 + $0x10c] sm:$0xf0]  ;;  %v1626_v58 = vld [vmem:[%s2553_s1 + $0x1a0] sm:$0xf]  ;;  %v1654_v59 = vld [vmem:[%s2553_s1 + $0x1d8] sm:$0xf] }
  0x38   : > { %v1735_v60 = vld [vmem:[%s2553_s1 + $0x1f0] sm:$0xf0]  ;;  %v1728_v61 = vld [vmem:[%s2553_s1 + $0x1b8] sm:$0xf0]  ;;  %v1539_v0 = vor.u32 %v1703_v56, %v1536_v57  ;;  %v1508_v3 = vld [vmem:[%s2553_s1 + $0xd4] sm:$0xf0] }
  0x39   : > { %v1655_v62 = vor.u32 %v1735_v60, %v1654_v59  ;;  %v1627_v1 = vor.u32 %v1728_v61, %v1626_v58  ;;  %v1696_v2 = vld [vmem:[%s2553_s1 + $0xbc] sm:$0xf]  ;;  %v1598_v4 = vld [vmem:[%s2553_s1 + $0x168] sm:$0xf]  ;;  %v1721_v5 = vld [vmem:[%s2553_s1 + $0x180] sm:$0xf0] }
  0x3a   : > { %930 = vmatpush.bf16.msrb.mxu0 %v1531_v9  ;;  %v1511_v6 = vor.u32 %v1696_v2, %v1508_v3  ;;  %v1599_v7 = vor.u32 %v1721_v5, %v1598_v4  ;;  %v1689_v8 = vld [vmem:[%s2553_s1 + $0x84] sm:$0xf]  ;;  %v1480_v9 = vld [vmem:[%s2553_s1 + $0x9c] sm:$0xf0]  ;;  %v1570_v10 = vld [vmem:[%s2553_s1 + $0x130] sm:$0xf] }
  0x3b   : > { %966 = vmatpush.bf16.msra.mxu1 %v1591_v12  ;;  %v1714_v11 = vld [vmem:[%s2553_s1 + $0x148] sm:$0xf0]  ;;  %v1483_v12 = vor.u32 %v1689_v8, %v1480_v9  ;;  %v1452_v15 = vld [vmem:[%s2553_s1 + $0x64] sm:$0xf0]  ;;  %v1542_v16 = vld [vmem:[%s2553_s1 + $0xf8] sm:$0xf] }
  0x3c   : > { %1657 = vmatmul.msk.bf16.gmra.mxu1 %vm808_vm4, %v2066_v18  ;;  %1659 = vmatmul.msk.bf16.gmra.mxu3 %vm808_vm4, %v2066_v18  ;;  %v1682_v14 = vld [vmem:[%s2553_s1 + $0x4c] sm:$0xf]  ;;  %v1707_v17 = vld [vmem:[%s2553_s1 + $0x110] sm:$0xf0]  ;;  %v1424_v23 = vld [vmem:[%s2553_s1 + $0x2c] sm:$0xf0] }
  0x3d   : > { %826 = vmatmul.bf16.gmra.mxu0 %v2068_v19  ;;  %v1675_v22 = vld [vmem:[%s2553_s1 + $0x14] sm:$0xf]  ;;  %v1514_v24 = vld [vmem:[%s2553_s1 + $0xc0] sm:$0xf]  ;;  %v1700_v25 = vld [vmem:[%s2553_s1 + $0xd8] sm:$0xf0] }
  0x3e   : > { %931 = vmatpush.bf16.msrb.mxu0 %v1503_v13  ;;  %864 = vmatmul.bf16.gmra.mxu2 %v2068_v19  ;;  %v1571_v13 = vor.u32 %v1714_v11, %v1570_v10  ;;  %v1486_v28 = vld [vmem:[%s2553_s1 + $0x88] sm:$0xf]  ;;  %v1693_v29 = vld [vmem:[%s2553_s1 + $0xa0] sm:$0xf0]  ;;  %v1458_v31 = vld [vmem:[%s2553_s1 + $0x50] sm:$0xf] }
  0x3f   : > { %967 = vmatpush.bf16.msra.mxu1 %v1563_v21  ;;  %v1543_v21 = vor.u32 %v1707_v17, %v1542_v16  ;;  %v1487_v30 = vor.u32 %v1693_v29, %v1486_v28  ;;  %v1686_v32 = vld [vmem:[%s2553_s1 + $0x68] sm:$0xf0]  ;;  %v1430_v34 = vld [vmem:[%s2553_s1 + $0x18] sm:$0xf]  ;;  %v1679_v35 = vld [vmem:[%s2553_s1 + $0x30] sm:$0xf0] }
  0x40   : > { %v1459_v33 = vor.u32 %v1686_v32, %v1458_v31  ;;  %v1431_v36 = vor.u32 %v1679_v35, %v1430_v34 }
  0x42   : > { %932 = vmatpush.bf16.msrb.mxu0 %v1475_v20  ;;  %v1455_v20 = vor.u32 %v1682_v14, %v1452_v15 }
  0x43   : > { %968 = vmatpush.bf16.msra.mxu1 %v1535_v27  ;;  %v1515_v27 = vor.u32 %v1700_v25, %v1514_v24 }
  0x46   : > { %933 = vmatpush.bf16.msrb.mxu0 %v1447_v26  ;;  %v1427_v26 = vor.u32 %v1675_v22, %v1424_v23 }
  0x47   : > { %969 = vmatpush.bf16.msra.mxu1 %v1507_v38 }
  0x4a   : > { %934 = vmatpush.bf16.msrb.mxu0 %v1419_v37  ;;  %v2253_v37 = vld [vmem:[%s2554_s2] sm:$0xff] }
  0x4b   : > { %970 = vmatpush.bf16.msra.mxu1 %v1479_v44  ;;  %v259_v38 = vperm.slane %v2253_v37, 1  ;;  %v261_v40 = vperm.slane %v2253_v37, 3  ;;  %v258_v41 = vperm.slane %v2253_v37, 0  ;;  %v263_v16 = vperm.slane %v2253_v37, 5 }
  0x4c   : > { %897 = vmatmul.bf16.vlgmr.msrb.gmra.mxu1 %v2011_v55  ;;  %1660 = vmatmul.msk.bf16.vlgmr.msrb.gmra.mxu3 %vm808_vm4, %v2009_v54  ;;  %v262_v17 = vperm.slane %v2253_v37, 4 }
  0x4d   : > { %935 = vmatmul.bf16.vlgmr.msrb.gmra.mxu0 %v2011_v55  ;;  %1067 = vmatpush.bf16.msrb.mxu3 %v1655_v62  ;;  %v319_v42 = vrot.slane %v259_v38, 6  ;;  %v321_v44 = vrot.slane %v261_v40, 2 }
  0x4e   : > { %1003 = vmatpush.bf16.msra.mxu0 %v1623_v39  ;;  %1662 = vmatmul.msk.bf16.vlgmr.msrb.gmra.mxu2 %vm808_vm4, %v2009_v54  ;;  %v260_v39 = vperm.slane %v2253_v37, 2 }
  0x4f   : > { %971 = vmatpush.bf16.msra.mxu1 %v1451_v50  ;;  %v342_v48 = vsel %vm326_vm6, %v258_v41, %v319_v42  ;;  %v325_v50 = vsel %vm324_vm5, %v258_v41, %v319_v42 }
  0x50   : > { %v320_v43 = vrot.slane %v260_v39, 4 }
  0x52   : > { %1004 = vmatpush.bf16.msra.mxu0 %v1595_v45  ;;  %v333_v45 = vsel %vm332_vm7, %v258_v41, %v319_v42  ;;  %v335_v46 = vsel %vm334_vm8, %v321_v44, %v320_v43  ;;  %v343_v49 = vsel %vm324_vm5, %v320_v43, %v321_v44  ;;  %v327_v51 = vsel %vm326_vm6, %v320_v43, %v321_v44 }
  0x53   : > { %972 = vmatpush.bf16.msra.mxu1 %v1423_v63  ;;  %v337_v47 = vsel %vm336_vm10, %v333_v45, %v335_v46  ;;  %v329_v56 = vsel %vm328_vm9, %v325_v50, %v327_v51 }
  0x54   : > { %v338_v52 = vrot.slane %v337_v47, 2  ;;  %717 = vst [vmem:[#allocation1] ss:$4 sm:$0xff] %v329_v56 }
  0x56   : > { %1005 = vmatpush.bf16.msra.mxu0 %v1567_v53  ;;  %v344_v53 = vsel %vm328_vm9, %v343_v49, %v342_v48  ;;  %719 = vst [vmem:[#allocation1 + $0x1] ss:$4 sm:$0xff] %v338_v52 }
  0x57   : > { %1041 = vmatpush.bf16.msrb.mxu1 %v1627_v1  ;;  %v345_v57 = vrot.slane %v344_v53, 4 }
  0x59   : > { %721 = vst [vmem:[#allocation1 + $0x2] ss:$4 sm:$0xff] %v345_v57 }
  0x5a   : > { %1006 = vmatpush.bf16.msra.mxu0 %v1539_v0 }
  0x5b   : > { %1042 = vmatpush.bf16.msrb.mxu1 %v1599_v7 }
  0x5c   : > { %902 = vmatmul.bf16.gmra.mxu1 %v2068_v19  ;;  %1661 = vmatmul.msk.bf16.gmra.mxu3 %vm808_vm4, %v2066_v18 }
  0x5d   : > { %940 = vmatmul.bf16.gmra.mxu0 %v2068_v19 }
  0x5e   : > { %1007 = vmatpush.bf16.msra.mxu0 %v1511_v6  ;;  %1663 = vmatmul.msk.bf16.gmra.mxu2 %vm808_vm4, %v2066_v18 }
  0x5f   : > { %1043 = vmatpush.bf16.msrb.mxu1 %v1571_v13 }
  0x62   : > { %1008 = vmatpush.bf16.msra.mxu0 %v1483_v12 }
  0x63   : > { %1044 = vmatpush.bf16.msrb.mxu1 %v1543_v21  ;;  %v322_v21 = vrot.slane %v263_v16, 6 }
  0x65   : > { %v339_v23 = vsel %vm332_vm7, %v262_v17, %v322_v21  ;;  %v346_v24 = vsel %vm326_vm6, %v262_v17, %v322_v21  ;;  %v353_v25 = vsel %vm334_vm8, %v322_v21, %v262_v17  ;;  %v330_v28 = vsel %vm324_vm5, %v262_v17, %v322_v21 }
  0x66   : > { %1009 = vmatpush.bf16.msra.mxu0 %v1455_v20  ;;  %v264_v20 = vperm.slane %v2253_v37, 6 }
  0x67   : > { %1045 = vmatpush.bf16.msrb.mxu1 %v1515_v27 }
  0x68   : > { %v323_v22 = vrot.slane %v264_v20, 4 }
  0x6a   : > { %1010 = vmatpush.bf16.msra.mxu0 %v1427_v26  ;;  %v340_v29 = vsel %vm336_vm10, %v339_v23, %v323_v22  ;;  %v2321_v31 = vsel %vm336_vm10, %v323_v22, %v353_v25 }
  0x6b   : > { %1046 = vmatpush.bf16.msrb.mxu1 %v1487_v30  ;;  %v347_v30 = vsel %vm328_vm9, %v323_v22, %v346_v24  ;;  %v2328_v34 = vrot.slane %v340_v29, 2  ;;  %v355_v37 = vrot.slane %v2321_v31, 6 }
  0x6c   : > { %973 = vmatmul.bf16.vlgmr.msra.gmra.mxu1 %v2011_v55  ;;  %1664 = vmatmul.msk.bf16.vlgmr.msra.gmra.mxu3 %vm808_vm4, %v2009_v54  ;;  %v2330_v35 = vrot.slane %v347_v30, 4 }
  0x6d   : > { %1011 = vmatmul.bf16.vlgmr.msra.gmra.mxu0 %v2011_v55  ;;  %727 = vst [vmem:[#allocation1 + $0x21] ss:$4 sm:$0xff] %v2328_v34 }
  0x6e   : > { %1666 = vmatmul.msk.bf16.vlgmr.msra.gmra.mxu2 %vm808_vm4, %v2009_v54  ;;  %729 = vst [vmem:[#allocation1 + $0x22] ss:$4 sm:$0xff] %v2330_v35 }
  0x6f   : > { %1047 = vmatpush.bf16.msrb.mxu1 %v1459_v33  ;;  %v2326_v33 = vsel %vm328_vm9, %v330_v28, %v323_v22  ;;  %731 = vst [vmem:[#allocation1 + $0x23] ss:$4 sm:$0xff] %v355_v37 }
  0x70   : > { %725 = vst [vmem:[#allocation1 + $0x20] ss:$4 sm:$0xff] %v2326_v33 }
  0x73   : > { %1048 = vmatpush.bf16.msrb.mxu1 %v1431_v36 }
  0x77   : > { %v2346_v46 = vld.sshfl [vmem:[#allocation1 + $0x20] sm:$0xff pattern:$0x73625140]  ;;  %v2348_v47 = vld.sshfl [vmem:[#allocation1 + $0x28] sm:$0xff pattern:$0x73625140] }
  0x78   : > { %v2351_v49 = vld.sshfl [vmem:[#allocation1 + $0x30] sm:$0xff pattern:$0x73625140] }
  0x79   : > { %743 = vst [vmem:[#allocation1 + $0x20] ss:$4 sm:$0xff] %v2326_v33 }
  0x7a   : > { %744 = vst [vmem:[#allocation1 + $0x21] ss:$4 sm:$0xff] %v2328_v34 }
  0x7b   : > { %745 = vst [vmem:[#allocation1 + $0x22] ss:$4 sm:$0xff] %v2330_v35 }
  0x7c   : > { %978 = vmatmul.bf16.gmra.mxu1 %v2068_v19  ;;  %1665 = vmatmul.msk.bf16.gmra.mxu3 %vm808_vm4, %v2066_v18  ;;  %746 = vst [vmem:[#allocation1 + $0x23] ss:$4 sm:$0xff] %v2326_v33 }
  0x7d   : > { %1016 = vmatmul.bf16.gmra.mxu0 %v2068_v19 }
  0x7e   : > { %1667 = vmatmul.msk.bf16.gmra.mxu2 %vm808_vm4, %v2066_v18 }
  0x8c   : > { %1049 = vmatmul.bf16.vlgmr.msrb.gmra.mxu1 %v2011_v55  ;;  %1668 = vmatmul.msk.bf16.vlgmr.msrb.gmra.mxu3 %vm808_vm4, %v2009_v54  ;;  %v349_v55 = vsel %vm334_vm8, %v319_v42, %v258_v41  ;;  %v350_v54 = vsel %vm332_vm7, %v320_v43, %v321_v44 }
  0x8d   : > { %v351_v58 = vsel %vm336_vm10, %v350_v54, %v349_v55 }
  0x8e   : > { %v352_v59 = vrot.slane %v351_v58, 6 }
  0x90   : > { %723 = vst [vmem:[#allocation1 + $0x3] ss:$4 sm:$0xff] %v352_v59 }
  0x97   : > { %v2274_v60 = vld.sshfl [vmem:[#allocation1] sm:$0xff pattern:$0x73625140]  ;;  %v733_v61 = vld.sshfl [vmem:[#allocation1 + $0x8] sm:$0xff pattern:$0x73625140] }
  0x98   : > { %v2276_v62 = vld.sshfl [vmem:[#allocation1 + $0x10] sm:$0xff pattern:$0x73625140]  ;;  %v2278_v63 = vld.sshfl [vmem:[#allocation1 + $0x18] sm:$0xff pattern:$0x73625140] }
  0x99   : > { %739 = vst [vmem:[#allocation1] ss:$4 sm:$0xff] %v329_v56 }
  0x9a   : > { %740 = vst [vmem:[#allocation1 + $0x1] ss:$4 sm:$0xff] %v338_v52 }
  0x9b   : > { %741 = vst [vmem:[#allocation1 + $0x2] ss:$4 sm:$0xff] %v345_v57 }
  0x9c   : > { %1054 = vmatmul.bf16.gmra.mxu1 %v2068_v19  ;;  %1669 = vmatmul.msk.bf16.gmra.mxu3 %vm808_vm4, %v2066_v18  ;;  %742 = vst [vmem:[#allocation1 + $0x3] ss:$4 sm:$0xff] %v329_v56 }
  0xa3   : > { %v2283_v0 = vld.sshfl [vmem:[#allocation1] sm:$0xff pattern:$0x73625140]  ;;  %v2285_v1 = vld.sshfl [vmem:[#allocation1 + $0x8] sm:$0xff pattern:$0x73625140] }
  0xa4   : > { %v2287_v2 = vld.sshfl [vmem:[#allocation1 + $0x10] sm:$0xff pattern:$0x73625140]  ;;  %v2289_v3 = vld.sshfl [vmem:[#allocation1 + $0x18] sm:$0xff pattern:$0x73625140] }
  0xa5   : > { %754 = vst [vmem:[#allocation1] ss:$4 sm:$0xff] %v338_v52 }
  0xa6   : > { %755 = vst [vmem:[#allocation1 + $0x1] ss:$4 sm:$0xff] %v345_v57 }
  0xa7   : > { %756 = vst [vmem:[#allocation1 + $0x2] ss:$4 sm:$0xff] %v352_v59 }
  0xa8   : > { %v841_v4 = vpop.f32.mrf.mxu1  ;;  %757 = vst [vmem:[#allocation1 + $0x3] ss:$4 sm:$0xff] %v329_v56 }
  0xaa   : > { %v822_v5 = vpop.f32.mrf.mxu0 }
  0xab   : > { %v823_v44 = vadd.f32 %v822_v5, %v2274_v60 }
  0xaf   : > { %v879_v19 = vpop.f32.mrf.mxu3  ;;  %v2293_v7 = vld.sshfl [vmem:[#allocation1] sm:$0xff pattern:$0x73625140]  ;;  %v2295_v8 = vld.sshfl [vmem:[#allocation1 + $0x8] sm:$0xff pattern:$0x73625140] }
  0xb0   : > { %v2291_v18 = vpop.f32.mrf.mxu1  ;;  %v2299_v10 = vld.sshfl [vmem:[#allocation1 + $0x10] sm:$0xff pattern:$0x73625140]  ;;  %v2301_v11 = vld.sshfl [vmem:[#allocation1 + $0x18] sm:$0xff pattern:$0x73625140] }
  0xb1   : > { %v860_v6 = vpop.f32.mrf.mxu2  ;;  %769 = vst [vmem:[#allocation1] ss:$4 sm:$0xff] %v338_v52  ;;  %v842_v52 = vadd.f32 %v841_v4, %v823_v44 }
  0xb2   : > { %v2297_v9 = vpop.f32.mrf.mxu0  ;;  %770 = vst [vmem:[#allocation1 + $0x1] ss:$4 sm:$0xff] %v345_v57  ;;  %v861_v38 = vadd.f32 %v860_v6, %v733_v61 }
  0xb4   : > { %v880_v42 = vadd.f32 %v879_v19, %v861_v38  ;;  %v825_v38 = vadd.f32 %v2297_v9, %v2283_v0 }
  0xb6   : > { %v1107_v50 = vrot.slane %v880_v42, 6  ;;  %v844_v0 = vadd.f32 %v2291_v18, %v825_v38 }
  0xb7   : > { %v881_v12 = vpop.f32.mrf.mxu3 }
  0xb8   : > { %v1127_v58 = vsel %vm324_vm5, %v842_v52, %v1107_v50  ;;  %v1132_v60 = vsel %vm332_vm7, %v842_v52, %v1107_v50  ;;  %v1139_v61 = vsel %vm326_vm6, %v842_v52, %v1107_v50  ;;  %v1146_v4 = vsel %vm334_vm8, %v1107_v50, %v842_v52  ;;  %v2384_v52 = vld.sshfl [vmem:[#allocation1 + $0x28] sm:$0xff pattern:$0x73625140] }
  0xb9   : > { %v862_v13 = vpop.f32.mrf.mxu2  ;;  %v2303_v14 = vpop.f32.mrf.mxu1  ;;  %v2363_v19 = vld.sshfl [vmem:[#allocation1 + $0x10] sm:$0xff pattern:$0x73625140]  ;;  %v2372_v22 = vld.sshfl [vmem:[#allocation1] sm:$0xff pattern:$0x73625140] }
  0xba   : > { %v2305_v15 = vpop.f32.mrf.mxu0  ;;  %v863_v53 = vadd.f32 %v862_v13, %v2285_v1  ;;  %v2366_v13 = vld.sshfl [vmem:[#allocation1 + $0x18] sm:$0xff pattern:$0x73625140]  ;;  %v2374_v23 = vld.sshfl [vmem:[#allocation1 + $0x8] sm:$0xff pattern:$0x73625140] }
  0xbc   : > { %v882_v1 = vadd.f32 %v881_v12, %v863_v53 }
  0xbf   : > { %v2313_v26 = vpop.f32.mrf.mxu3 }
  0xc1   : > { %v2315_v27 = vpop.f32.mrf.mxu2  ;;  %v2323_v32 = vpop.f32.mrf.mxu1 }
  0xc2   : > { %v2332_v36 = vpop.f32.mrf.mxu0  ;;  %v866_v9 = vadd.f32 %v2315_v27, %v2295_v8 }
  0xc7   : > { %v2340_v39 = vpop.f32.mrf.mxu3 }
  0xc9   : > { %v2342_v40 = vpop.f32.mrf.mxu2  ;;  %v898_v41 = vpop.f32.mrf.mxu1 }
  0xca   : > { %v936_v43 = vpop.f32.mrf.mxu0  ;;  %v899_v45 = vadd.f32 %v898_v41, %v2276_v62 }
  0xcb   : > { %v937_v48 = vadd.f32 %v936_v43, %v2278_v63  ;;  %v1112_v43 = vrot.slane %v882_v1, 6  ;;  %v828_v1 = vadd.f32 %v2305_v15, %v2293_v7 }
  0xcd   : > { %v1165_v18 = vsel %vm326_vm6, %v844_v0, %v1112_v43 }
  0xcf   : > { %v917_v51 = vpop.f32.mrf.mxu3 }
  0xd0   : > { %v918_v56 = vadd.f32 %v917_v51, %v899_v45 }
  0xd1   : > { %v955_v57 = vpop.f32.mrf.mxu2  ;;  %v900_v55 = vpop.f32.mrf.mxu1 }
  0xd2   : > { %v956_v54 = vadd.f32 %v955_v57, %v937_v48  ;;  %v938_v59 = vpop.f32.mrf.mxu0  ;;  %v1108_v62 = vrot.slane %v918_v56, 4  ;;  %v901_v5 = vadd.f32 %v900_v55, %v2287_v2  ;;  %v2382_v48 = vld.sshfl [vmem:[#allocation1 + $0x20] sm:$0xff pattern:$0x73625140] }
  0xd3   : > { %v939_v6 = vadd.f32 %v938_v59, %v2289_v3  ;;  %v2386_v56 = vld.sshfl [vmem:[#allocation1 + $0x30] sm:$0xff pattern:$0x73625140]  ;;  %v1158_v59 = vsel %vm332_vm7, %v844_v0, %v1112_v43 }
  0xd4   : > { %v1109_v63 = vrot.slane %v956_v54, 2  ;;  %758 = vst [vmem:[#allocation1 + $0x20] ss:$4 sm:$0xff] %v2328_v34 }
  0xd5   : > { %759 = vst [vmem:[#allocation1 + $0x21] ss:$4 sm:$0xff] %v2330_v35 }
  0xd6   : > { %v1128_v16 = vsel %vm326_vm6, %v1108_v62, %v1109_v63  ;;  %v1133_v17 = vsel %vm334_vm8, %v1109_v63, %v1108_v62  ;;  %v1140_v20 = vsel %vm324_vm5, %v1108_v62, %v1109_v63  ;;  %v1147_v21 = vsel %vm332_vm7, %v1108_v62, %v1109_v63  ;;  %760 = vst [vmem:[#allocation1 + $0x22] ss:$4 sm:$0xff] %v355_v37 }
  0xd7   : > { %v1129_v2 = vsel %vm328_vm9, %v1127_v58, %v1128_v16  ;;  %v1134_v12 = vsel %vm336_vm10, %v1132_v60, %v1133_v17  ;;  %v1141_v3 = vsel %vm328_vm9, %v1140_v20, %v1139_v61  ;;  %v1148_v24 = vsel %vm336_vm10, %v1147_v21, %v1146_v4  ;;  %v919_v25 = vpop.f32.mrf.mxu3  ;;  %761 = vst [vmem:[#allocation1 + $0x23] ss:$4 sm:$0xff] %v2326_v33 }
  0xd8   : > { %v1135_v28 = vrot.slane %v1134_v12, 2  ;;  %v1142_v29 = vrot.slane %v1141_v3, 4  ;;  %v1149_v30 = vrot.slane %v1148_v24, 6  ;;  %1217 = vst [vmem:[#allocation1] ss:$4 sm:$0xff] %v1129_v2  ;;  %v920_v41 = vadd.f32 %v919_v25, %v901_v5 }
  0xd9   : > { %v957_v42 = vpop.f32.mrf.mxu2  ;;  %v903_v44 = vpop.f32.mrf.mxu1  ;;  %v1153_v33 = vsel %vm324_vm5, %v844_v0, %v1112_v43  ;;  %v847_v12 = vadd.f32 %v2303_v14, %v828_v1 }
  0xda   : > { %v958_v45 = vadd.f32 %v957_v42, %v939_v6  ;;  %1219 = vst [vmem:[#allocation1 + $0x1] ss:$4 sm:$0xff] %v1135_v28  ;;  %v1113_v50 = vrot.slane %v920_v41, 4  ;;  %v941_v51 = vpop.f32.mrf.mxu0  ;;  %v904_v57 = vadd.f32 %v903_v44, %v2299_v10 }
  0xdb   : > { %1221 = vst [vmem:[#allocation1 + $0x2] ss:$4 sm:$0xff] %v1142_v29  ;;  %v942_v58 = vadd.f32 %v941_v51, %v2301_v11  ;;  %v885_v11 = vadd.f32 %v2313_v26, %v866_v9  ;;  %v1172_v29 = vsel %vm334_vm8, %v1112_v43, %v844_v0 }
  0xdc   : > { %v1114_v53 = vrot.slane %v958_v45, 2  ;;  %1223 = vst [vmem:[#allocation1 + $0x3] ss:$4 sm:$0xff] %v1149_v30 }
  0xdd   : > { %v1117_v21 = vrot.slane %v885_v11, 6  ;;  %v830_v11 = vadd.f32 %v2332_v36, %v2372_v22 }
  0xde   : > { %v1159_v55 = vsel %vm334_vm8, %v1114_v53, %v1113_v50  ;;  %v1166_v54 = vsel %vm324_vm5, %v1113_v50, %v1114_v53  ;;  %v1154_v61 = vsel %vm326_vm6, %v1113_v50, %v1114_v53  ;;  %v1173_v3 = vsel %vm332_vm7, %v1113_v50, %v1114_v53  ;;  %v2421_v25 = vld.sshfl [vmem:[#allocation1 + $0x20] sm:$0xff pattern:$0x73625140]  ;;  %v2424_v28 = vld.sshfl [vmem:[#allocation1 + $0x28] sm:$0xff pattern:$0x73625140] }
  0xdf   : > { %v922_v8 = vpop.f32.mrf.mxu3  ;;  %v1160_v27 = vsel %vm336_vm10, %v1158_v59, %v1159_v55  ;;  %v1167_v10 = vsel %vm328_vm9, %v1166_v54, %v1165_v18  ;;  %v1155_v17 = vsel %vm328_vm9, %v1153_v33, %v1154_v61  ;;  %v1184_v30 = vsel %vm332_vm7, %v847_v12, %v1117_v21  ;;  %v2432_v42 = vld.sshfl [vmem:[#allocation1 + $0x30] sm:$0xff pattern:$0x73625140] }
  0xe0   : > { %v923_v31 = vadd.f32 %v922_v8, %v904_v57  ;;  %v1161_v63 = vrot.slane %v1160_v27, 2  ;;  %v1168_v5 = vrot.slane %v1167_v10, 4  ;;  %v1191_v14 = vsel %vm326_vm6, %v847_v12, %v1117_v21  ;;  %771 = vst [vmem:[#allocation1 + $0x20] ss:$4 sm:$0xff] %v2328_v34 }
  0xe1   : > { %v960_v60 = vpop.f32.mrf.mxu2  ;;  %v905_v37 = vpop.f32.mrf.mxu1  ;;  %v1174_v44 = vsel %vm336_vm10, %v1173_v3, %v1172_v29  ;;  %772 = vst [vmem:[#allocation1 + $0x21] ss:$4 sm:$0xff] %v2330_v35  ;;  %v868_v55 = vadd.f32 %v2342_v40, %v2374_v23  ;;  %v1179_v59 = vsel %vm324_vm5, %v847_v12, %v1117_v21 }
  0xe2   : > { %v961_v62 = vadd.f32 %v960_v60, %v942_v58  ;;  %v1118_v2 = vrot.slane %v923_v31, 4  ;;  %v943_v41 = vpop.f32.mrf.mxu0  ;;  %v1175_v51 = vrot.slane %v1174_v44, 6  ;;  %v906_v35 = vadd.f32 %v905_v37, %v2363_v19 }
  0xe3   : > { %v1232_v4 = vld.sshfl [vmem:[#allocation1] sm:$0xff pattern:$0x73625140]  ;;  %v1233_v16 = vld.sshfl [vmem:[#allocation1 + $0x8] sm:$0xff pattern:$0x73625140]  ;;  %v944_v43 = vadd.f32 %v943_v41, %v2366_v13  ;;  %v887_v40 = vadd.f32 %v2340_v39, %v868_v55  ;;  %v1198_v31 = vsel %vm334_vm8, %v1117_v21, %v847_v12 }
  0xe4   : > { %v1119_v6 = vrot.slane %v961_v62, 2  ;;  %1308 = vst [vmem:[%s2408_s24] sm:$0xff] %v1232_v4  ;;  %v1234_v26 = vld.sshfl [vmem:[#allocation1 + $0x10] sm:$0xff pattern:$0x73625140] }
  0xe5   : > { %v1235_v20 = vld.sshfl [vmem:[#allocation1 + $0x18] sm:$0xff pattern:$0x73625140]  ;;  %1309 = vst [vmem:[%s2408_s24 + $0x8] sm:$0xff] %v1233_v16  ;;  %v1122_v37 = vrot.slane %v887_v40, 6 }
  0xe6   : > { %1239 = vst [vmem:[#allocation1] ss:$4 sm:$0xff] %v1155_v17  ;;  %v1185_v7 = vsel %vm334_vm8, %v1119_v6, %v1118_v2  ;;  %v1192_v15 = vsel %vm324_vm5, %v1118_v2, %v1119_v6  ;;  %v1180_v53 = vsel %vm326_vm6, %v1118_v2, %v1119_v6  ;;  %v1199_v60 = vsel %vm332_vm7, %v1118_v2, %v1119_v6 }
  0xe7   : > { %1240 = vst [vmem:[#allocation1 + $0x1] ss:$4 sm:$0xff] %v1161_v63  ;;  %v924_v24 = vpop.f32.mrf.mxu3  ;;  %v1186_v45 = vsel %vm336_vm10, %v1184_v30, %v1185_v7  ;;  %v1193_v50 = vsel %vm328_vm9, %v1192_v15, %v1191_v14  ;;  %v1181_v8 = vsel %vm328_vm9, %v1179_v59, %v1180_v53  ;;  %v1200_v62 = vsel %vm336_vm10, %v1199_v60, %v1198_v31 }
  0xe8   : > { %1241 = vst [vmem:[#allocation1 + $0x2] ss:$4 sm:$0xff] %v1168_v5  ;;  %v1187_v0 = vrot.slane %v1186_v45, 2  ;;  %v1194_v9 = vrot.slane %v1193_v50, 4  ;;  %v925_v23 = vadd.f32 %v924_v24, %v906_v35  ;;  %v849_v63 = vadd.f32 %v2323_v32, %v830_v11 }
  0xe9   : > { %v2429_v38 = vpop.f32.mrf.mxu1  ;;  %1310 = vst [vmem:[%s2408_s24 + $0x10] sm:$0xff] %v1234_v26  ;;  %v962_v57 = vpop.f32.mrf.mxu2  ;;  %v1201_v22 = vrot.slane %v1200_v62, 6  ;;  %v2498_v35 = vld.sshfl [vmem:[#allocation1 + $0x20] sm:$0xff pattern:$0x73625140] }
  0xea   : > { %1311 = vst [vmem:[%s2408_s24 + $0x18] sm:$0xff] %v1235_v20  ;;  %v963_v27 = vadd.f32 %v962_v57, %v944_v43  ;;  %v1123_v61 = vrot.slane %v925_v23, 4  ;;  %v1210_v33 = vsel %vm332_vm7, %v849_v63, %v1122_v37  ;;  %v1205_v20 = vsel %vm324_vm5, %v849_v63, %v1122_v37  ;;  %v1012_v3 = vpop.f32.mrf.mxu0  ;;  %v778_v40 = vld.sshfl [vmem:[#allocation1 + $0x28] sm:$0xff pattern:$0x73625140] }
  0xeb   : > { %v1013_v24 = vadd.f32 %v1012_v3, %v2348_v47  ;;  %v975_v50 = vadd.f32 %v2429_v38, %v2346_v46 }
  0xec   : > { %v1124_v19 = vrot.slane %v963_v27, 2 }
  0xee   : > { %v1211_v36 = vsel %vm334_vm8, %v1124_v19, %v1123_v61  ;;  %v1206_v26 = vsel %vm326_vm6, %v1123_v61, %v1124_v19 }
  0xef   : > { %v1245_v54 = vld.sshfl [vmem:[#allocation1] sm:$0xff pattern:$0x73625140]  ;;  %v1246_v58 = vld.sshfl [vmem:[#allocation1 + $0x8] sm:$0xff pattern:$0x73625140]  ;;  %v2445_v18 = vpop.f32.mrf.mxu3  ;;  %v1212_v17 = vsel %vm336_vm10, %v1210_v33, %v1211_v36  ;;  %v1207_v2 = vsel %vm328_vm9, %v1205_v20, %v1206_v26 }
  0xf0   : > { %v1247_v34 = vld.sshfl [vmem:[#allocation1 + $0x10] sm:$0xff pattern:$0x73625140]  ;;  %v1248_v13 = vld.sshfl [vmem:[#allocation1 + $0x18] sm:$0xff pattern:$0x73625140] }
  0xf1   : > { %1252 = vst [vmem:[#allocation1] ss:$4 sm:$0xff] %v1175_v51  ;;  %v2449_v10 = vpop.f32.mrf.mxu1  ;;  %v1213_v32 = vrot.slane %v1212_v17, 2  ;;  %v1031_v7 = vpop.f32.mrf.mxu2 }
  0xf2   : > { %1253 = vst [vmem:[#allocation1 + $0x1] ss:$4 sm:$0xff] %v1181_v8  ;;  %v1032_v44 = vadd.f32 %v1031_v7, %v1013_v24  ;;  %v1014_v43 = vpop.f32.mrf.mxu0  ;;  %v977_v31 = vadd.f32 %v2449_v10, %v2382_v48 }
  0xf3   : > { %1254 = vst [vmem:[#allocation1 + $0x2] ss:$4 sm:$0xff] %v1187_v0  ;;  %v1015_v53 = vadd.f32 %v1014_v43, %v2384_v52 }
  0xf4   : > { %1255 = vst [vmem:[#allocation1 + $0x3] ss:$4 sm:$0xff] %v1194_v9  ;;  %v1110_v47 = vrot.slane %v1032_v44, 6  ;;  %v994_v9 = vadd.f32 %v2445_v18, %v975_v50 }
  0xf5   : > { %1315 = vst [vmem:[%s2408_s24 + $0x38] sm:$0x3f] %v1245_v54 }
  0xf6   : > { %1316 = vst [vmem:[%s2408_s24 + $0x40] sm:$0x3f] %v1246_v58  ;;  %v1130_v58 = vsel %vm324_vm5, %v994_v9, %v1110_v47  ;;  %v1136_v46 = vsel %vm332_vm7, %v994_v9, %v1110_v47  ;;  %v1150_v38 = vsel %vm334_vm8, %v1110_v47, %v994_v9 }
  0xf7   : > { %1317 = vst [vmem:[%s2408_s24 + $0x48] sm:$0x3f] %v1247_v34  ;;  %v2461_v39 = vpop.f32.mrf.mxu3  ;;  %v2493_v34 = vld.sshfl [vmem:[#allocation1 + $0x30] sm:$0xff pattern:$0x73625140] }
  0xf8   : > { %1318 = vst [vmem:[%s2408_s24 + $0x50] sm:$0x3f] %v1248_v13  ;;  %v996_v36 = vadd.f32 %v2461_v39, %v977_v31 }
  0xf9   : > { %v2465_v4 = vpop.f32.mrf.mxu1  ;;  %v1033_v57 = vpop.f32.mrf.mxu2 }
  0xfa   : > { %v1034_v13 = vadd.f32 %v1033_v57, %v1015_v53  ;;  %v1017_v61 = vpop.f32.mrf.mxu0 }
  0xfb   : > { %v1260_v1 = vld.sshfl [vmem:[#allocation1] sm:$0xff pattern:$0x73625140]  ;;  %v1261_v5 = vld.sshfl [vmem:[#allocation1 + $0x8] sm:$0xff pattern:$0x73625140] }
  0xfc   : > { %v1262_v6 = vld.sshfl [vmem:[#allocation1 + $0x10] sm:$0xff pattern:$0x73625140]  ;;  %v1263_v16 = vld.sshfl [vmem:[#allocation1 + $0x18] sm:$0xff pattern:$0x73625140] }
  0xfd   : > { %1267 = vst [vmem:[#allocation1] ss:$4 sm:$0xff] %v1201_v22  ;;  %v1115_v37 = vrot.slane %v1034_v13, 6  ;;  %v1018_v22 = vadd.f32 %v1017_v61, %v2424_v28  ;;  %v980_v28 = vadd.f32 %v2465_v4, %v2421_v25 }
  0xfe   : > { %1322 = vst [vmem:[%s2408_s24 + $0x70] sm:$0xff] %v1260_v1 }
  0xff   : > { %1323 = vst [vmem:[%s2408_s24 + $0x78] sm:$0xff] %v1261_v5  ;;  %v2474_v21 = vpop.f32.mrf.mxu3  ;;  %v1162_v1 = vsel %vm332_vm7, %v996_v36, %v1115_v37  ;;  %v1169_v5 = vsel %vm326_vm6, %v996_v36, %v1115_v37  ;;  %v1156_v20 = vsel %vm324_vm5, %v996_v36, %v1115_v37  ;;  %v1176_v25 = vsel %vm334_vm8, %v1115_v37, %v996_v36 }
 0x100   : > { %1324 = vst [vmem:[%s2408_s24 + $0x80] sm:$0xff] %v1262_v6 }
 0x101   : > { %1325 = vst [vmem:[%s2408_s24 + $0x88] sm:$0xff] %v1263_v16  ;;  %v2478_v12 = vpop.f32.mrf.mxu1 }
 0x102   : > { %1268 = vst [vmem:[#allocation1 + $0x1] ss:$4 sm:$0xff] %v1207_v2 }
 0x103   : > { %1269 = vst [vmem:[#allocation1 + $0x2] ss:$4 sm:$0xff] %v1213_v32 }
 0x107   : > { %v2481_v15 = vpop.f32.mrf.mxu3 }
 0x109   : > { %v1050_v14 = vpop.f32.mrf.mxu1 }
 0x10a   : > { %v1273_v29 = vld.sshfl [vmem:[#allocation1] sm:$0xff pattern:$0x73625140]  ;;  %v1274_v30 = vld.sshfl [vmem:[#allocation1 + $0x8] sm:$0xff pattern:$0x73625140]  ;;  %v1051_v51 = vadd.f32 %v1050_v14, %v2351_v49  ;;  %v1143_v49 = vsel %vm326_vm6, %v994_v9, %v1110_v47  ;;  %v999_v14 = vadd.f32 %v2474_v21, %v980_v28 }
 0x10b   : > { %v1275_v41 = vld.sshfl [vmem:[#allocation1 + $0x10] sm:$0xff pattern:$0x73625140]  ;;  %v1276_v45 = vld.sshfl [vmem:[#allocation1 + $0x18] sm:$0xff pattern:$0x73625140] }
 0x10c   : > { %1329 = vst [vmem:[%s2408_s24 + $0xa8] sm:$0x3f] %v1273_v29 }
 0x10d   : > { %1330 = vst [vmem:[%s2408_s24 + $0xb0] sm:$0x3f] %v1274_v30 }
 0x10e   : > { %1331 = vst [vmem:[%s2408_s24 + $0xb8] sm:$0x3f] %v1275_v41  ;;  %v1019_v41 = vpop.f32.mrf.mxu0 }
 0x10f   : > { %1332 = vst [vmem:[%s2408_s24 + $0xc0] sm:$0x3f] %v1276_v45  ;;  %v1069_v0 = vpop.f32.mrf.mxu3  ;;  %v1020_v43 = vadd.f32 %v1019_v41, %v778_v40 }
 0x110   : > { %v1070_v55 = vadd.f32 %v1069_v0, %v1051_v51 }
 0x111   : > { %v1052_v54 = vpop.f32.mrf.mxu1 }
 0x112   : > { %v1111_v59 = vrot.slane %v1070_v55, 4  ;;  %v1053_v19 = vadd.f32 %v1052_v54, %v2386_v56  ;;  %v1036_v56 = vpop.f32.mrf.mxu2 }
 0x113   : > { %v1037_v17 = vadd.f32 %v1036_v56, %v1018_v22 }
 0x114   : > { %v1131_v52 = vsel %vm328_vm9, %v1130_v58, %v1111_v59  ;;  %v1137_v18 = vsel %vm336_vm10, %v1136_v46, %v1111_v59  ;;  %v1144_v8 = vsel %vm328_vm9, %v1111_v59, %v1143_v49  ;;  %v1151_v27 = vsel %vm336_vm10, %v1111_v59, %v1150_v38 }
 0x115   : > { %v1138_v23 = vrot.slane %v1137_v18, 2  ;;  %v1145_v60 = vrot.slane %v1144_v8, 4  ;;  %v1152_v11 = vrot.slane %v1151_v27, 6  ;;  %1225 = vst [vmem:[#allocation1 + $0x20] ss:$4 sm:$0xff] %v1131_v52  ;;  %v1120_v30 = vrot.slane %v1037_v17, 6 }
 0x116   : > { %v982_v52 = vadd.f32 %v2478_v12, %v2498_v35 }
 0x117   : > { %v1071_v62 = vpop.f32.mrf.mxu3  ;;  %1227 = vst [vmem:[#allocation1 + $0x21] ss:$4 sm:$0xff] %v1138_v23  ;;  %v1188_v4 = vsel %vm332_vm7, %v999_v14, %v1120_v30  ;;  %v1195_v50 = vsel %vm326_vm6, %v999_v14, %v1120_v30  ;;  %v1182_v54 = vsel %vm324_vm5, %v999_v14, %v1120_v30  ;;  %v1202_v8 = vsel %vm334_vm8, %v1120_v30, %v999_v14 }
 0x118   : > { %v1072_v63 = vadd.f32 %v1071_v62, %v1053_v19  ;;  %1229 = vst [vmem:[#allocation1 + $0x22] ss:$4 sm:$0xff] %v1145_v60  ;;  %v1001_v27 = vadd.f32 %v2481_v15, %v982_v52 }
 0x119   : > { %1231 = vst [vmem:[#allocation1 + $0x23] ss:$4 sm:$0xff] %v1152_v11  ;;  %v1055_v6 = vpop.f32.mrf.mxu1 }
 0x11a   : > { %v1116_v33 = vrot.slane %v1072_v63, 4  ;;  %v1056_v16 = vadd.f32 %v1055_v6, %v2432_v42  ;;  %v1038_v21 = vpop.f32.mrf.mxu2 }
 0x11b   : > { %v1039_v49 = vadd.f32 %v1038_v21, %v1020_v43 }
 0x11c   : > { %v1163_v48 = vsel %vm336_vm10, %v1162_v1, %v1116_v33  ;;  %v1170_v10 = vsel %vm328_vm9, %v1116_v33, %v1169_v5  ;;  %v1157_v7 = vsel %vm328_vm9, %v1156_v20, %v1116_v33  ;;  %v1177_v44 = vsel %vm336_vm10, %v1116_v33, %v1176_v25 }
 0x11d   : > { %v1164_v26 = vrot.slane %v1163_v48, 2  ;;  %v1171_v39 = vrot.slane %v1170_v10, 4  ;;  %v1178_v53 = vrot.slane %v1177_v44, 6  ;;  %v1125_v18 = vrot.slane %v1039_v49, 6 }
 0x11f   : > { %v1074_v32 = vpop.f32.mrf.mxu3  ;;  %v1214_v23 = vsel %vm332_vm7, %v1001_v27, %v1125_v18  ;;  %v1208_v37 = vsel %vm324_vm5, %v1001_v27, %v1125_v18 }
 0x120   : > { %v1075_v2 = vadd.f32 %v1074_v32, %v1056_v16  ;;  %v1236_v3 = vld.sshfl [vmem:[#allocation1 + $0x20] sm:$0xff pattern:$0x73625140]  ;;  %v1237_v24 = vld.sshfl [vmem:[#allocation1 + $0x28] sm:$0xff pattern:$0x73625140] }
 0x121   : > { %v1238_v29 = vld.sshfl [vmem:[#allocation1 + $0x30] sm:$0xff pattern:$0x73625140]  ;;  %1312 = vst [vmem:[%s2408_s24 + $0x20] sm:$0xff] %v1236_v3  ;;  %v1057_v47 = vpop.f32.mrf.mxu1 }
 0x122   : > { %1242 = vst [vmem:[#allocation1 + $0x20] ss:$4 sm:$0xff] %v1157_v7  ;;  %v1121_v42 = vrot.slane %v1075_v2, 4  ;;  %v1058_v59 = vadd.f32 %v1057_v47, %v2493_v34 }
 0x123   : > { %1243 = vst [vmem:[#allocation1 + $0x21] ss:$4 sm:$0xff] %v1164_v26 }
 0x124   : > { %1244 = vst [vmem:[#allocation1 + $0x22] ss:$4 sm:$0xff] %v1171_v39  ;;  %v1189_v45 = vsel %vm336_vm10, %v1188_v4, %v1121_v42  ;;  %v1196_v51 = vsel %vm328_vm9, %v1121_v42, %v1195_v50  ;;  %v1183_v38 = vsel %vm328_vm9, %v1182_v54, %v1121_v42  ;;  %v1203_v40 = vsel %vm336_vm10, %v1121_v42, %v1202_v8 }
 0x125   : > { %1313 = vst [vmem:[%s2408_s24 + $0x28] sm:$0xff] %v1237_v24  ;;  %v1190_v0 = vrot.slane %v1189_v45, 2  ;;  %v1197_v58 = vrot.slane %v1196_v51, 4  ;;  %v1204_v60 = vrot.slane %v1203_v40, 6 }
 0x126   : > { %1314 = vst [vmem:[%s2408_s24 + $0x30] sm:$0xff] %v1238_v29 }
 0x127   : > { %v1076_v55 = vpop.f32.mrf.mxu3 }
 0x128   : > { %v1077_v13 = vadd.f32 %v1076_v55, %v1058_v59 }
 0x12a   : > { %v1126_v34 = vrot.slane %v1077_v13, 4 }
 0x12b   : > { %v1249_v9 = vld.sshfl [vmem:[#allocation1 + $0x20] sm:$0xff pattern:$0x73625140]  ;;  %v1250_v57 = vld.sshfl [vmem:[#allocation1 + $0x28] sm:$0xff pattern:$0x73625140] }
 0x12c   : > { %v1251_v46 = vld.sshfl [vmem:[#allocation1 + $0x30] sm:$0xff pattern:$0x73625140]  ;;  %1319 = vst [vmem:[%s2408_s24 + $0x58] sm:$0x3f] %v1249_v9  ;;  %v1215_v11 = vsel %vm336_vm10, %v1214_v23, %v1126_v34  ;;  %v1209_v15 = vsel %vm328_vm9, %v1208_v37, %v1126_v34 }
 0x12d   : > { %1256 = vst [vmem:[#allocation1 + $0x20] ss:$4 sm:$0xff] %v1178_v53  ;;  %v1216_v31 = vrot.slane %v1215_v11, 2 }
 0x12e   : > { %1257 = vst [vmem:[#allocation1 + $0x21] ss:$4 sm:$0xff] %v1183_v38 }
 0x12f   : > { %1258 = vst [vmem:[#allocation1 + $0x22] ss:$4 sm:$0xff] %v1190_v0 }
 0x130   : > { %1259 = vst [vmem:[#allocation1 + $0x23] ss:$4 sm:$0xff] %v1197_v58 }
 0x131   : > { %1320 = vst [vmem:[%s2408_s24 + $0x60] sm:$0x3f] %v1250_v57 }
 0x132   : > { %1321 = vst [vmem:[%s2408_s24 + $0x68] sm:$0x3f] %v1251_v46 }
 0x137   : > { %v1264_v19 = vld.sshfl [vmem:[#allocation1 + $0x20] sm:$0xff pattern:$0x73625140]  ;;  %v1265_v12 = vld.sshfl [vmem:[#allocation1 + $0x28] sm:$0xff pattern:$0x73625140] }
 0x138   : > { %v1266_v35 = vld.sshfl [vmem:[#allocation1 + $0x30] sm:$0xff pattern:$0x73625140]  ;;  %1326 = vst [vmem:[%s2408_s24 + $0x90] sm:$0xff] %v1264_v19 }
 0x139   : > { %1270 = vst [vmem:[#allocation1 + $0x20] ss:$4 sm:$0xff] %v1204_v60 }
 0x13a   : > { %1327 = vst [vmem:[%s2408_s24 + $0x98] sm:$0xff] %v1265_v12 }
 0x13b   : > { %1328 = vst [vmem:[%s2408_s24 + $0xa0] sm:$0xff] %v1266_v35 }
 0x13c   : > { %1271 = vst [vmem:[#allocation1 + $0x21] ss:$4 sm:$0xff] %v1209_v15 }
 0x13d   : > { %1272 = vst [vmem:[#allocation1 + $0x22] ss:$4 sm:$0xff] %v1216_v31 }
 0x144   : > { %v1277_v61 = vld.sshfl [vmem:[#allocation1 + $0x20] sm:$0xff pattern:$0x73625140]  ;;  %v1278_v62 = vld.sshfl [vmem:[#allocation1 + $0x28] sm:$0xff pattern:$0x73625140] }
 0x145   : > { %v1279_v63 = vld.sshfl [vmem:[#allocation1 + $0x30] sm:$0xff pattern:$0x73625140]  ;;  %1333 = vst [vmem:[%s2408_s24 + $0xc8] sm:$0x3f] %v1277_v61 }
 0x146   : > { %1334 = vst [vmem:[%s2408_s24 + $0xd0] sm:$0x3f] %v1278_v62 }
 0x147   : > { %1335 = vst [vmem:[%s2408_s24 + $0xd8] sm:$0x3f] %v1279_v63 }
 0x148 PF: > { %s13_s12 = sadd.s32 1, %s1751_s12  }
 0x149   : > { %p10_p4 = scmp.ge.s32.totalorder %s13_s12, 4  }
 0x14b   :  { %12 = sbr.rel (!%p10_p4) target bundleno = 1 (0x1), region = 83 }

// kernel: tile.8
= control target key start
LH: loop header
LB: loop body
LE: loop exit
PB: predicated region body
PF: predicated region fallthrough
CT: control target
= control target key end

     0   :  { %s28_s0 = inlined_call_operand.vmem [shape: f32[64], index: 0, kind: input, shape index: {}]   ;;  %s29_s1 = inlined_call_operand.vmem [shape: f32[14,64], index: 1, kind: output, shape index: {}]  }
   0x1   :  { %v4_v0 = vld [vmem:[%s28_s0] ss:$0 sm:$0xff] }
   0x2   :  { %5 = vst [vmem:[%s29_s1] sm:$0xff] %v4_v0 }
   0x3   :  { %8 = vst [vmem:[%s29_s1 + $0x8] sm:$0xff] %v4_v0 }

// kernel: tile.9
= control target key start
LH: loop header
LB: loop body
LE: loop exit
PB: predicated region body
PF: predicated region fallthrough
CT: control target
= control target key end

     0   :  { %vm3_vm0 = vcmask 523264   ;;  %s63_s8 = smov 64   ;;  %vm10_vm1 = vcmask 1048064   ;;  %s101_s0 = inlined_call_operand.vmem [shape: f32[14,64], index: 0, kind: input, shape index: {}]   ;;  %s102_s1 = inlined_call_operand.vmem [shape: f32[1,896], index: 1, kind: output, shape index: {}]  }
   0x1   :  { %v55_v0 = vld [vmem:[%s101_s0 + $0x1] ss:$2 sm:$0x7f]   ;;  %v2_v1 = vld [vmem:[%s101_s0] ss:$2 sm:$0x7f]  }
   0x2   :  { %8 = vrot.lane.b32.xlu0 %v55_v0, %s63_s8  ;;  %4 = vst.msk [vmem:[#allocation0] ss:$8 sm:$0xf] %vm3_vm0, %v2_v1  }
   0x3   :  { %5 = vst.msk [vmem:[#allocation0] ss:$8 sm:$0x70] %vm3_vm0, %v2_v1  }
  0x74   :  { %v9_v2 = vpop.permute.xlu0 %8  }
  0x75   :  { %11 = vst.msk [vmem:[#allocation0] ss:$8 sm:$0xf] %vm10_vm1, %v9_v2  }
  0x76   :  { %12 = vst.msk [vmem:[#allocation0] ss:$8 sm:$0x70] %vm10_vm1, %v9_v2  }
  0x7c   :  { %v15_v3 = vld [vmem:[#allocation0] sm:$0x1]  ;;  %v20_v4 = vld [vmem:[#allocation0 + $0x8] sm:$0x1]  ;;  %v26_v5 = vld [vmem:[#allocation0 + $0x10] sm:$0x1] }
  0x7d   :  { %18 = vst [vmem:[%s102_s1] sm:$0x1] %v15_v3  ;;  %v32_v6 = vld [vmem:[#allocation0 + $0x18] sm:$0x1]  ;;  %v38_v7 = vld [vmem:[#allocation0 + $0x20] sm:$0x1] }
  0x7e   :  { %56 = vst [vmem:[%s102_s1 + $0x1] sm:$0x1] %v20_v4  ;;  %v44_v8 = vld [vmem:[#allocation0 + $0x28] sm:$0x1]  ;;  %v50_v9 = vld [vmem:[#allocation0 + $0x30] sm:$0x1] }
  0x7f   :  { %57 = vst [vmem:[%s102_s1 + $0x2] sm:$0x1] %v26_v5 }
  0x80   :  { %58 = vst [vmem:[%s102_s1 + $0x3] sm:$0x1] %v32_v6 }
  0x81   :  { %59 = vst [vmem:[%s102_s1 + $0x4] sm:$0x1] %v38_v7 }
  0x82   :  { %60 = vst [vmem:[%s102_s1 + $0x5] sm:$0x1] %v44_v8 }
  0x83   :  { %61 = vst [vmem:[%s102_s1 + $0x6] sm:$0x1] %v50_v9 }

// kernel: _tudui_forward_impl.1
= control target key start
LH: loop header
LB: loop body
LE: loop exit
PB: predicated region body
PF: predicated region fallthrough
CT: control target
= control target key end

     0   :  { %s1773_s12 = smov 0   ;;  %s2552_s0 = inlined_call_operand.vmem [shape: bf16[4,14,144], index: 0, kind: input, shape index: {}]   ;;  %s2553_s1 = inlined_call_operand.vmem [shape: bf16[144,896], index: 1, kind: input, shape index: {}]   ;;  %s2554_s2 = inlined_call_operand.vmem [shape: f32[1,896], index: 2, kind: input, shape index: {}]   ;;  %s2555_s3 = inlined_call_operand.vmem [shape: f32[4,14,896], index: 3, kind: output, shape index: {}]  }
   0x1 LB: > { %s1394_s13 = sadd.s32 4294967295, %s1751_s12   ;;  %p1398_p0 = scmp.ge.s32.totalorder %s1751_s12, 1  ;;  %s1751_s12 = sphi %s1773_s12, %s13_s12  }
   0x2   : > { %p139_p1 = scmp.lt.s32.totalorder %s1751_s12, 3 }
   0x4   : > { %p140_p2 = pnand %p1398_p0, %p139_p1 }
   0x5   : > { %s1399_s27 = sshll.u32 (!%p140_p2), %s1394_s13, 1 }
   0x6   : > { %143 = sbr.rel (%p140_p2) target bundleno = 328 (0x148), region = 32  ;;  %p166_p3 = scmp.lt.s32.totalorder (!%p140_p2), %s1399_s27, 3 }
   0xb   : > { %v1602_v0 = vld [vmem:[%s2553_s1 + $0x188] sm:$0xf]  ;;  %v1725_v1 = vld [vmem:[%s2553_s1 + $0x1a0] sm:$0xf0]  ;;  %v1722_v2 = vld [vmem:[%s2553_s1 + $0x18c] sm:$0xf] }
   0xc   : > { %v1603_v3 = vor.u32 %v1725_v1, %v1602_v0  ;;  %v1604_v4 = vld [vmem:[%s2553_s1 + $0x1a4] sm:$0xf0]  ;;  %v1574_v5 = vld [vmem:[%s2553_s1 + $0x150] sm:$0xf]  ;;  %v1718_v6 = vld [vmem:[%s2553_s1 + $0x168] sm:$0xf0] }
   0xd   : > { %v1607_v7 = vor.u32 %v1722_v2, %v1604_v4  ;;  %v1715_v8 = vld [vmem:[%s2553_s1 + $0x154] sm:$0xf]  ;;  %v1576_v9 = vld [vmem:[%s2553_s1 + $0x16c] sm:$0xf0]  ;;  %v1575_v10 = vor.u32 %v1718_v6, %v1574_v5  ;;  %v1546_v12 = vld [vmem:[%s2553_s1 + $0x118] sm:$0xf] }
   0xe   : > { %813 = vmatpush.bf16.msra.mxu0 %v1603_v3  ;;  %v1579_v11 = vor.u32 %v1715_v8, %v1576_v9  ;;  %v1711_v13 = vld [vmem:[%s2553_s1 + $0x130] sm:$0xf0]  ;;  %v1708_v14 = vld [vmem:[%s2553_s1 + $0x11c] sm:$0xf]  ;;  %v1548_v15 = vld [vmem:[%s2553_s1 + $0x134] sm:$0xf0] }
   0xf   : > { %851 = vmatpush.bf16.msra.mxu2 %v1607_v7  ;;  %v1630_v16 = vld [vmem:[%s2553_s1 + $0x1c0] sm:$0xf]  ;;  %v1732_v17 = vld [vmem:[%s2553_s1 + $0x1d8] sm:$0xf0]  ;;  %v1729_v19 = vld [vmem:[%s2553_s1 + $0x1c4] sm:$0xf]  ;;  %v1547_v21 = vor.u32 %v1711_v13, %v1546_v12  ;;  %v1551_v25 = vor.u32 %v1708_v14, %v1548_v15 }
  0x10   : > { %v1631_v18 = vor.u32 %v1732_v17, %v1630_v16  ;;  %v1632_v20 = vld [vmem:[%s2553_s1 + $0x1dc] sm:$0xf0]  ;;  %v1704_v23 = vld [vmem:[%s2553_s1 + $0xf8] sm:$0xf0]  ;;  %v1701_v26 = vld [vmem:[%s2553_s1 + $0xe4] sm:$0xf] }
  0x11   : > { %v1518_v22 = vld [vmem:[%s2553_s1 + $0xe0] sm:$0xf]  ;;  %v1635_v24 = vor.u32 %v1729_v19, %v1632_v20  ;;  %v1638_v27 = vld [vmem:[%s2553_s1 + $0x1c8] sm:$0xf]  ;;  %v1733_v29 = vld [vmem:[%s2553_s1 + $0x1e0] sm:$0xf0] }
  0x12   : > { %814 = vmatpush.bf16.msra.mxu0 %v1575_v10  ;;  %839 = vmatpush.bf16.msra.mxu1 %v1631_v18  ;;  %v1520_v28 = vld [vmem:[%s2553_s1 + $0xfc] sm:$0xf0]  ;;  %v1639_v30 = vor.u32 %v1733_v29, %v1638_v27  ;;  %v1610_v31 = vld [vmem:[%s2553_s1 + $0x190] sm:$0xf]  ;;  %v1726_v32 = vld [vmem:[%s2553_s1 + $0x1a8] sm:$0xf0]  ;;  %v1519_v33 = vor.u32 %v1704_v23, %v1518_v22 }
  0x13   : > { %852 = vmatpush.bf16.msra.mxu2 %v1579_v11  ;;  %877 = vmatpush.bf16.msra.mxu3 %v1635_v24  ;;  %v1490_v34 = vld [vmem:[%s2553_s1 + $0xa8] sm:$0xf]  ;;  %v1697_v35 = vld [vmem:[%s2553_s1 + $0xc0] sm:$0xf0]  ;;  %s2557_s27 = smov (!%p166_p3, %s1399_s27), 3  ;;  %v1611_v36 = vor.u32 %v1726_v32, %v1610_v31  ;;  %v1523_v37 = vor.u32 %v1701_v26, %v1520_v28  ;;  %vm273_vm0 = vcmask 1040384  }
  0x14   : > { %v1694_v38 = vld [vmem:[%s2553_s1 + $0xac] sm:$0xf]  ;;  %v1582_v39 = vld [vmem:[%s2553_s1 + $0x158] sm:$0xf]  ;;  %v1719_v40 = vld [vmem:[%s2553_s1 + $0x170] sm:$0xf0]  ;;  %v1491_v46 = vor.u32 %v1697_v35, %v1490_v34 }
  0x15   : > { %v1492_v41 = vld [vmem:[%s2553_s1 + $0xc4] sm:$0xf0]  ;;  %s1672_s24 = sshll.u32 %s2557_s27, 4  ;;  %vm277_vm1 = vcmask 1041409   ;;  %v1583_v42 = vor.u32 %v1719_v40, %v1582_v39  ;;  %v1462_v43 = vld [vmem:[%s2553_s1 + $0x70] sm:$0xf] }
  0x16   : > { %815 = vmatpush.bf16.msra.mxu0 %v1547_v21  ;;  %889 = vmatpush.bf16.msrb.mxu1 %v1611_v36  ;;  %s1879_s28 = scalar_lea.vmem %s2552_s0, %s1672_s24  ;;  %v1690_v44 = vld [vmem:[%s2553_s1 + $0x88] sm:$0xf0]  ;;  %v1554_v45 = vld [vmem:[%s2553_s1 + $0x120] sm:$0xf]  ;;  %vm281_vm2 = vcmask 1042434   ;;  %vm285_vm3 = vcmask 1043459   ;;  %v1495_v50 = vor.u32 %v1694_v38, %v1492_v41 }
  0x17   : > { %853 = vmatpush.bf16.msra.mxu2 %v1551_v25  ;;  %915 = vmatpush.bf16.msrb.mxu3 %v1639_v30  ;;  %v180_v47 = vld [vmem:[%s1879_s28] sm:$0xff]  ;;  %v181_v48 = vld [vmem:[%s1879_s28 + $0x8] sm:$0x77]  ;;  %v1893_v49 = vld [vmem:[%s1879_s28 + $0x10] sm:$0xff]  ;;  %v1463_v55 = vor.u32 %v1690_v44, %v1462_v43  ;;  %vm808_vm4 = vcmask 130048   ;;  %vm324_vm5 = vcmask 1041408  }
  0x18   : > { %v269_v51 = vrot.slane %v180_v47, 3  ;;  %v270_v52 = vrot.slane %v181_v48, 3  ;;  %v1712_v53 = vld [vmem:[%s2553_s1 + $0x138] sm:$0xf0]  ;;  %v1899_v54 = vrot.slane %v1893_v49, 3  ;;  %vm326_vm6 = vcmask 1045508  }
  0x19   : > { %v1687_v56 = vld [vmem:[%s2553_s1 + $0x74] sm:$0xf]  ;;  %v1464_v57 = vld [vmem:[%s2553_s1 + $0x8c] sm:$0xf0]  ;;  %v1555_v58 = vor.u32 %v1712_v53, %v1554_v45  ;;  %v1434_v63 = vld [vmem:[%s2553_s1 + $0x38] sm:$0xf] }
  0x1a   : > { %816 = vmatpush.bf16.msra.mxu0 %v1519_v33  ;;  %890 = vmatpush.bf16.msrb.mxu1 %v1583_v42  ;;  %v276_v59 = vsel %vm273_vm0, %v180_v47, %v269_v51  ;;  %v278_v60 = vsel %vm277_vm1, %v180_v47, %v269_v51  ;;  %v282_v61 = vsel %vm281_vm2, %v180_v47, %v269_v51  ;;  %v1683_v0 = vld [vmem:[%s2553_s1 + $0x50] sm:$0xf0]  ;;  %v1526_v1 = vld [vmem:[%s2553_s1 + $0xe8] sm:$0xf]  ;;  %v1705_v2 = vld [vmem:[%s2553_s1 + $0x100] sm:$0xf0] }
  0x1b   : > { %854 = vmatpush.bf16.msra.mxu2 %v1523_v37  ;;  %v286_v62 = vsel %vm285_vm3, %v180_v47, %v269_v51  ;;  %v280_v3 = vrot.slane %v278_v60, 1  ;;  %v284_v4 = vrot.slane %v282_v61, 2  ;;  %v291_v6 = vsel %vm273_vm0, %v181_v48, %v270_v52  ;;  %356 = vst [vmem:[#allocation1] ss:$9 sm:$0xff] %v276_v59  ;;  %v1680_v10 = vld [vmem:[%s2553_s1 + $0x3c] sm:$0xf] }
  0x1c   : > { %v288_v5 = vrot.slane %v286_v62, 3  ;;  %v292_v7 = vsel %vm277_vm1, %v181_v48, %v270_v52  ;;  %v295_v8 = vsel %vm281_vm2, %v181_v48, %v270_v52  ;;  %367 = vst [vmem:[#allocation1 + $0x4] ss:$9 sm:$0xff] %v291_v6  ;;  %v1467_v9 = vor.u32 %v1687_v56, %v1464_v57  ;;  %v1436_v11 = vld [vmem:[%s2553_s1 + $0x54] sm:$0xf0]  ;;  %s1736_s22 = smul.u32 112, %s2557_s27 }
  0x1d   : > { %v294_v12 = vrot.slane %v292_v7, 1  ;;  %v297_v13 = vrot.slane %v295_v8, 2  ;;  %359 = vst [vmem:[#allocation1 + $0x1] ss:$9 sm:$0xff] %v280_v3  ;;  %v1933_v14 = vld [vmem:[%s1879_s28 + $0x18] sm:$0x77]  ;;  %v1527_v16 = vor.u32 %v1705_v2, %v1526_v1  ;;  %v300_v19 = vsel %vm273_vm0, %v1893_v49, %v1899_v54 }
  0x1e   : > { %817 = vmatpush.bf16.msra.mxu0 %v1491_v46  ;;  %891 = vmatpush.bf16.msrb.mxu1 %v1555_v58  ;;  %362 = vst [vmem:[#allocation1 + $0x2] ss:$9 sm:$0xff] %v284_v4  ;;  %v1406_v15 = vld [vmem:[%s2553_s1] sm:$0xf]  ;;  %v1498_v17 = vld [vmem:[%s2553_s1 + $0xb0] sm:$0xf]  ;;  %v1435_v20 = vor.u32 %v1683_v0, %v1434_v63  ;;  %v1439_v23 = vor.u32 %v1680_v10, %v1436_v11  ;;  %s2408_s24 = scalar_lea.vmem %s2555_s3, %s1736_s22 }
  0x1f   : > { %855 = vmatpush.bf16.msra.mxu2 %v1495_v50  ;;  %v1698_v18 = vld [vmem:[%s2553_s1 + $0xc8] sm:$0xf0]  ;;  %365 = vst [vmem:[#allocation1 + $0x3] ss:$9 sm:$0xff] %v288_v5  ;;  %v1676_v21 = vld [vmem:[%s2553_s1 + $0x18] sm:$0xf0]  ;;  %v301_v26 = vsel %vm277_vm1, %v1893_v49, %v1899_v54  ;;  %v304_v35 = vsel %vm281_vm2, %v1893_v49, %v1899_v54  ;;  %v307_v36 = vsel %vm285_vm3, %v1893_v49, %v1899_v54 }
  0x20   : > { %v1673_v22 = vld [vmem:[%s2553_s1 + $0x4] sm:$0xf]  ;;  %370 = vst [vmem:[#allocation1 + $0x5] ss:$9 sm:$0xff] %v294_v12  ;;  %v1408_v24 = vld [vmem:[%s2553_s1 + $0x1c] sm:$0xf0]  ;;  %v1499_v27 = vor.u32 %v1698_v18, %v1498_v17  ;;  %v1407_v32 = vor.u32 %v1676_v21, %v1406_v15 }
  0x21   : > { %v272_v25 = vrot.slane %v1933_v14, 3  ;;  %373 = vst [vmem:[#allocation1 + $0x6] ss:$9 sm:$0xff] %v297_v13  ;;  %v1723_v28 = vld [vmem:[%s2553_s1 + $0x194] sm:$0xf]  ;;  %v1411_v33 = vor.u32 %v1673_v22, %v1408_v24  ;;  %v303_v34 = vrot.slane %v301_v26, 1 }
  0x22   : > { %818 = vmatpush.bf16.msra.mxu0 %v1463_v55  ;;  %892 = vmatpush.bf16.msrb.mxu1 %v1527_v16  ;;  %v1612_v29 = vld [vmem:[%s2553_s1 + $0x1ac] sm:$0xf0]  ;;  %375 = vst [vmem:[#allocation1 + $0x7] ss:$9 sm:$0xff] %v300_v19  ;;  %v1470_v30 = vld [vmem:[%s2553_s1 + $0x78] sm:$0xf] }
  0x23   : > { %856 = vmatpush.bf16.msra.mxu2 %v1467_v9  ;;  %v1691_v31 = vld [vmem:[%s2553_s1 + $0x90] sm:$0xf0]  ;;  %v1615_v37 = vor.u32 %v1723_v28, %v1612_v29  ;;  %v1716_v39 = vld [vmem:[%s2553_s1 + $0x15c] sm:$0xf]  ;;  %v1584_v40 = vld [vmem:[%s2553_s1 + $0x174] sm:$0xf0]  ;;  %v313_v42 = vsel %vm277_vm1, %v1933_v14, %v272_v25  ;;  %v316_v43 = vsel %vm281_vm2, %v1933_v14, %v272_v25  ;;  %v312_v60 = vsel %vm273_vm0, %v1933_v14, %v272_v25 }
  0x24   : > { %v1471_v38 = vor.u32 %v1691_v31, %v1470_v30  ;;  %v1730_v41 = vld [vmem:[%s2553_s1 + $0x1cc] sm:$0xf]  ;;  %v1442_v44 = vld [vmem:[%s2553_s1 + $0x40] sm:$0xf]  ;;  %v1684_v45 = vld [vmem:[%s2553_s1 + $0x58] sm:$0xf0]  ;;  %v1587_v50 = vor.u32 %v1716_v39, %v1584_v40 }
  0x25   : > { %v1640_v46 = vld [vmem:[%s2553_s1 + $0x1e4] sm:$0xf0]  ;;  %v306_v47 = vrot.slane %v304_v35, 2  ;;  %v309_v48 = vrot.slane %v307_v36, 3  ;;  %v1709_v51 = vld [vmem:[%s2553_s1 + $0x124] sm:$0xf]  ;;  %v1443_v58 = vor.u32 %v1684_v45, %v1442_v44 }
  0x26   : > { %819 = vmatpush.bf16.msra.mxu0 %v1435_v20  ;;  %893 = vmatpush.bf16.msrb.mxu1 %v1499_v27  ;;  %v1643_v49 = vor.u32 %v1730_v41, %v1640_v46  ;;  %v1556_v52 = vld [vmem:[%s2553_s1 + $0x13c] sm:$0xf0]  ;;  %v1414_v53 = vld [vmem:[%s2553_s1 + $0x8] sm:$0xf]  ;;  %v315_v56 = vrot.slane %v313_v42, 1  ;;  %v318_v57 = vrot.slane %v316_v43, 2 }
  0x27   : > { %857 = vmatpush.bf16.msra.mxu2 %v1439_v23  ;;  %v1677_v59 = vld [vmem:[%s2553_s1 + $0x20] sm:$0xf0]  ;;  %v1646_v61 = vld [vmem:[%s2553_s1 + $0x1d0] sm:$0xf]  ;;  %v1734_v62 = vld [vmem:[%s2553_s1 + $0x1e8] sm:$0xf0]  ;;  %v1559_v2 = vor.u32 %v1709_v51, %v1556_v52 }
  0x28   : > { %v1647_v63 = vor.u32 %v1734_v62, %v1646_v61  ;;  %v1618_v0 = vld [vmem:[%s2553_s1 + $0x198] sm:$0xf]  ;;  %v1727_v1 = vld [vmem:[%s2553_s1 + $0x1b0] sm:$0xf0]  ;;  %v1415_v3 = vor.u32 %v1677_v59, %v1414_v53  ;;  %v1702_v4 = vld [vmem:[%s2553_s1 + $0xec] sm:$0xf] }
  0x29   : > { %v2009_v54 = vld [vmem:[#allocation1 + $0x9] sm:$0xff]  ;;  %v2011_v55 = vld [vmem:[#allocation1] sm:$0xff]  ;;  %v1619_v6 = vor.u32 %v1727_v1, %v1618_v0  ;;  %v1720_v8 = vld [vmem:[%s2553_s1 + $0x178] sm:$0xf0]  ;;  %vm332_vm7 = vcmask 1043458   ;;  %vm334_vm8 = vcmask 1045504  }
  0x2a   : > { %820 = vmatpush.bf16.msra.mxu0 %v1407_v32  ;;  %894 = vmatpush.bf16.msrb.mxu1 %v1471_v38  ;;  %379 = vst [vmem:[#allocation1] ss:$9 sm:$0xff] %v303_v34  ;;  %v1528_v5 = vld [vmem:[%s2553_s1 + $0x104] sm:$0xf0]  ;;  %v1590_v7 = vld [vmem:[%s2553_s1 + $0x160] sm:$0xf] }
  0x2b   : > { %858 = vmatpush.bf16.msra.mxu2 %v1411_v33  ;;  %1656 = vmatmul.msk.bf16.vlgmr.msra.gmra.mxu1 %vm808_vm4, %v2009_v54  ;;  %381 = vst [vmem:[#allocation1 + $0x1] ss:$9 sm:$0xff] %v306_v47  ;;  %v1531_v9 = vor.u32 %v1702_v4, %v1528_v5  ;;  %v1695_v10 = vld [vmem:[%s2553_s1 + $0xb4] sm:$0xf]  ;;  %v1500_v11 = vld [vmem:[%s2553_s1 + $0xcc] sm:$0xf0]  ;;  %v1591_v12 = vor.u32 %v1720_v8, %v1590_v7 }
  0x2c   : > { %1658 = vmatmul.msk.bf16.vlgmr.msra.gmra.mxu3 %vm808_vm4, %v2009_v54  ;;  %383 = vst [vmem:[#allocation1 + $0x2] ss:$9 sm:$0xff] %v309_v48  ;;  %v1503_v13 = vor.u32 %v1695_v10, %v1500_v11  ;;  %v1688_v14 = vld [vmem:[%s2553_s1 + $0x7c] sm:$0xf]  ;;  %v1472_v15 = vld [vmem:[%s2553_s1 + $0x94] sm:$0xf0] }
  0x2d   : > { %821 = vmatmul.bf16.vlgmr.msra.gmra.mxu0 %v2011_v55  ;;  %384 = vst [vmem:[#allocation1 + $0x3] ss:$9 sm:$0xff] %v312_v60  ;;  %991 = vmatpush.bf16.msra.mxu3 %v1647_v63  ;;  %v1562_v16 = vld [vmem:[%s2553_s1 + $0x128] sm:$0xf]  ;;  %v1713_v17 = vld [vmem:[%s2553_s1 + $0x140] sm:$0xf0]  ;;  %v1475_v20 = vor.u32 %v1688_v14, %v1472_v15 }
  0x2e   : > { %927 = vmatpush.bf16.msrb.mxu0 %v1615_v37  ;;  %859 = vmatmul.bf16.vlgmr.msra.gmra.mxu2 %v2011_v55  ;;  %386 = vst [vmem:[#allocation1 + $0x4] ss:$9 sm:$0xff] %v315_v56  ;;  %v1563_v21 = vor.u32 %v1713_v17, %v1562_v16  ;;  %v1681_v22 = vld [vmem:[%s2553_s1 + $0x44] sm:$0xf]  ;;  %v1444_v23 = vld [vmem:[%s2553_s1 + $0x5c] sm:$0xf0] }
  0x2f   : > { %953 = vmatpush.bf16.msrb.mxu2 %v1643_v49  ;;  %895 = vmatpush.bf16.msrb.mxu1 %v1443_v58  ;;  %388 = vst [vmem:[#allocation1 + $0x5] ss:$9 sm:$0xff] %v318_v57  ;;  %v1534_v24 = vld [vmem:[%s2553_s1 + $0xf0] sm:$0xf]  ;;  %v1706_v25 = vld [vmem:[%s2553_s1 + $0x108] sm:$0xf0]  ;;  %v1447_v26 = vor.u32 %v1681_v22, %v1444_v23 }
  0x30   : > { %v1535_v27 = vor.u32 %v1706_v25, %v1534_v24  ;;  %v1674_v28 = vld [vmem:[%s2553_s1 + $0xc] sm:$0xf]  ;;  %v1416_v29 = vld [vmem:[%s2553_s1 + $0x24] sm:$0xf0]  ;;  %v1506_v30 = vld [vmem:[%s2553_s1 + $0xb8] sm:$0xf] }
  0x31   : > { %v1699_v31 = vld [vmem:[%s2553_s1 + $0xd0] sm:$0xf0]  ;;  %v1724_v32 = vld [vmem:[%s2553_s1 + $0x19c] sm:$0xf]  ;;  %v1620_v33 = vld [vmem:[%s2553_s1 + $0x1b4] sm:$0xf0]  ;;  %v1419_v37 = vor.u32 %v1674_v28, %v1416_v29 }
  0x32   : > { %928 = vmatpush.bf16.msrb.mxu0 %v1587_v50  ;;  %v1731_v34 = vld [vmem:[%s2553_s1 + $0x1d4] sm:$0xf]  ;;  %v1648_v35 = vld [vmem:[%s2553_s1 + $0x1ec] sm:$0xf0]  ;;  %v1507_v38 = vor.u32 %v1699_v31, %v1506_v30  ;;  %v1623_v39 = vor.u32 %v1724_v32, %v1620_v33  ;;  %v1478_v40 = vld [vmem:[%s2553_s1 + $0x80] sm:$0xf] }
  0x33   : > { %896 = vmatpush.bf16.msrb.mxu1 %v1415_v3  ;;  %v1651_v36 = vor.u32 %v1731_v34, %v1648_v35  ;;  %v1692_v41 = vld [vmem:[%s2553_s1 + $0x98] sm:$0xf0]  ;;  %v1717_v42 = vld [vmem:[%s2553_s1 + $0x164] sm:$0xf]  ;;  %v1592_v43 = vld [vmem:[%s2553_s1 + $0x17c] sm:$0xf0] }
  0x34   : > { %v1479_v44 = vor.u32 %v1692_v41, %v1478_v40  ;;  %v1595_v45 = vor.u32 %v1717_v42, %v1592_v43  ;;  %v1450_v46 = vld [vmem:[%s2553_s1 + $0x48] sm:$0xf]  ;;  %v1685_v47 = vld [vmem:[%s2553_s1 + $0x60] sm:$0xf0]  ;;  %v1710_v48 = vld [vmem:[%s2553_s1 + $0x12c] sm:$0xf] }
  0x35   : > { %1029 = vmatpush.bf16.msra.mxu2 %v1651_v36  ;;  %v1564_v49 = vld [vmem:[%s2553_s1 + $0x144] sm:$0xf0]  ;;  %v1451_v50 = vor.u32 %v1685_v47, %v1450_v46  ;;  %v1422_v51 = vld [vmem:[%s2553_s1 + $0x10] sm:$0xf]  ;;  %v1678_v52 = vld [vmem:[%s2553_s1 + $0x28] sm:$0xf0] }
  0x36   : > { %929 = vmatpush.bf16.msrb.mxu0 %v1559_v2  ;;  %v2066_v18 = vld [vmem:[#allocation1 + $0x9] sm:$0xff]  ;;  %v2068_v19 = vld [vmem:[#allocation1] sm:$0xff]  ;;  %v1567_v53 = vor.u32 %v1710_v48, %v1564_v49  ;;  %v1703_v56 = vld [vmem:[%s2553_s1 + $0xf4] sm:$0xf]  ;;  %v1423_v63 = vor.u32 %v1678_v52, %v1422_v51  ;;  %vm328_vm9 = vcmask 1043456   ;;  %vm336_vm10 = vcmask 1045506  }
  0x37   : > { %965 = vmatpush.bf16.msra.mxu1 %v1619_v6  ;;  %v1536_v57 = vld [vmem:[%s2553_s1 + $0x10c] sm:$0xf0]  ;;  %v1626_v58 = vld [vmem:[%s2553_s1 + $0x1a0] sm:$0xf]  ;;  %v1654_v59 = vld [vmem:[%s2553_s1 + $0x1d8] sm:$0xf] }
  0x38   : > { %v1735_v60 = vld [vmem:[%s2553_s1 + $0x1f0] sm:$0xf0]  ;;  %v1728_v61 = vld [vmem:[%s2553_s1 + $0x1b8] sm:$0xf0]  ;;  %v1539_v0 = vor.u32 %v1703_v56, %v1536_v57  ;;  %v1508_v3 = vld [vmem:[%s2553_s1 + $0xd4] sm:$0xf0] }
  0x39   : > { %v1655_v62 = vor.u32 %v1735_v60, %v1654_v59  ;;  %v1627_v1 = vor.u32 %v1728_v61, %v1626_v58  ;;  %v1696_v2 = vld [vmem:[%s2553_s1 + $0xbc] sm:$0xf]  ;;  %v1598_v4 = vld [vmem:[%s2553_s1 + $0x168] sm:$0xf]  ;;  %v1721_v5 = vld [vmem:[%s2553_s1 + $0x180] sm:$0xf0] }
  0x3a   : > { %930 = vmatpush.bf16.msrb.mxu0 %v1531_v9  ;;  %v1511_v6 = vor.u32 %v1696_v2, %v1508_v3  ;;  %v1599_v7 = vor.u32 %v1721_v5, %v1598_v4  ;;  %v1689_v8 = vld [vmem:[%s2553_s1 + $0x84] sm:$0xf]  ;;  %v1480_v9 = vld [vmem:[%s2553_s1 + $0x9c] sm:$0xf0]  ;;  %v1570_v10 = vld [vmem:[%s2553_s1 + $0x130] sm:$0xf] }
  0x3b   : > { %966 = vmatpush.bf16.msra.mxu1 %v1591_v12  ;;  %v1714_v11 = vld [vmem:[%s2553_s1 + $0x148] sm:$0xf0]  ;;  %v1483_v12 = vor.u32 %v1689_v8, %v1480_v9  ;;  %v1452_v15 = vld [vmem:[%s2553_s1 + $0x64] sm:$0xf0]  ;;  %v1542_v16 = vld [vmem:[%s2553_s1 + $0xf8] sm:$0xf] }
  0x3c   : > { %1657 = vmatmul.msk.bf16.gmra.mxu1 %vm808_vm4, %v2066_v18  ;;  %1659 = vmatmul.msk.bf16.gmra.mxu3 %vm808_vm4, %v2066_v18  ;;  %v1682_v14 = vld [vmem:[%s2553_s1 + $0x4c] sm:$0xf]  ;;  %v1707_v17 = vld [vmem:[%s2553_s1 + $0x110] sm:$0xf0]  ;;  %v1424_v23 = vld [vmem:[%s2553_s1 + $0x2c] sm:$0xf0] }
  0x3d   : > { %826 = vmatmul.bf16.gmra.mxu0 %v2068_v19  ;;  %v1675_v22 = vld [vmem:[%s2553_s1 + $0x14] sm:$0xf]  ;;  %v1514_v24 = vld [vmem:[%s2553_s1 + $0xc0] sm:$0xf]  ;;  %v1700_v25 = vld [vmem:[%s2553_s1 + $0xd8] sm:$0xf0] }
  0x3e   : > { %931 = vmatpush.bf16.msrb.mxu0 %v1503_v13  ;;  %864 = vmatmul.bf16.gmra.mxu2 %v2068_v19  ;;  %v1571_v13 = vor.u32 %v1714_v11, %v1570_v10  ;;  %v1486_v28 = vld [vmem:[%s2553_s1 + $0x88] sm:$0xf]  ;;  %v1693_v29 = vld [vmem:[%s2553_s1 + $0xa0] sm:$0xf0]  ;;  %v1458_v31 = vld [vmem:[%s2553_s1 + $0x50] sm:$0xf] }
  0x3f   : > { %967 = vmatpush.bf16.msra.mxu1 %v1563_v21  ;;  %v1543_v21 = vor.u32 %v1707_v17, %v1542_v16  ;;  %v1487_v30 = vor.u32 %v1693_v29, %v1486_v28  ;;  %v1686_v32 = vld [vmem:[%s2553_s1 + $0x68] sm:$0xf0]  ;;  %v1430_v34 = vld [vmem:[%s2553_s1 + $0x18] sm:$0xf]  ;;  %v1679_v35 = vld [vmem:[%s2553_s1 + $0x30] sm:$0xf0] }
  0x40   : > { %v1459_v33 = vor.u32 %v1686_v32, %v1458_v31  ;;  %v1431_v36 = vor.u32 %v1679_v35, %v1430_v34 }
  0x42   : > { %932 = vmatpush.bf16.msrb.mxu0 %v1475_v20  ;;  %v1455_v20 = vor.u32 %v1682_v14, %v1452_v15 }
  0x43   : > { %968 = vmatpush.bf16.msra.mxu1 %v1535_v27  ;;  %v1515_v27 = vor.u32 %v1700_v25, %v1514_v24 }
  0x46   : > { %933 = vmatpush.bf16.msrb.mxu0 %v1447_v26  ;;  %v1427_v26 = vor.u32 %v1675_v22, %v1424_v23 }
  0x47   : > { %969 = vmatpush.bf16.msra.mxu1 %v1507_v38 }
  0x4a   : > { %934 = vmatpush.bf16.msrb.mxu0 %v1419_v37  ;;  %v2253_v37 = vld [vmem:[%s2554_s2] sm:$0xff] }
  0x4b   : > { %970 = vmatpush.bf16.msra.mxu1 %v1479_v44  ;;  %v259_v38 = vperm.slane %v2253_v37, 1  ;;  %v261_v40 = vperm.slane %v2253_v37, 3  ;;  %v258_v41 = vperm.slane %v2253_v37, 0  ;;  %v263_v16 = vperm.slane %v2253_v37, 5 }
  0x4c   : > { %897 = vmatmul.bf16.vlgmr.msrb.gmra.mxu1 %v2011_v55  ;;  %1660 = vmatmul.msk.bf16.vlgmr.msrb.gmra.mxu3 %vm808_vm4, %v2009_v54  ;;  %v262_v17 = vperm.slane %v2253_v37, 4 }
  0x4d   : > { %935 = vmatmul.bf16.vlgmr.msrb.gmra.mxu0 %v2011_v55  ;;  %1067 = vmatpush.bf16.msrb.mxu3 %v1655_v62  ;;  %v319_v42 = vrot.slane %v259_v38, 6  ;;  %v321_v44 = vrot.slane %v261_v40, 2 }
  0x4e   : > { %1003 = vmatpush.bf16.msra.mxu0 %v1623_v39  ;;  %1662 = vmatmul.msk.bf16.vlgmr.msrb.gmra.mxu2 %vm808_vm4, %v2009_v54  ;;  %v260_v39 = vperm.slane %v2253_v37, 2 }
  0x4f   : > { %971 = vmatpush.bf16.msra.mxu1 %v1451_v50  ;;  %v342_v48 = vsel %vm326_vm6, %v258_v41, %v319_v42  ;;  %v325_v50 = vsel %vm324_vm5, %v258_v41, %v319_v42 }
  0x50   : > { %v320_v43 = vrot.slane %v260_v39, 4 }
  0x52   : > { %1004 = vmatpush.bf16.msra.mxu0 %v1595_v45  ;;  %v333_v45 = vsel %vm332_vm7, %v258_v41, %v319_v42  ;;  %v335_v46 = vsel %vm334_vm8, %v321_v44, %v320_v43  ;;  %v343_v49 = vsel %vm324_vm5, %v320_v43, %v321_v44  ;;  %v327_v51 = vsel %vm326_vm6, %v320_v43, %v321_v44 }
  0x53   : > { %972 = vmatpush.bf16.msra.mxu1 %v1423_v63  ;;  %v337_v47 = vsel %vm336_vm10, %v333_v45, %v335_v46  ;;  %v329_v56 = vsel %vm328_vm9, %v325_v50, %v327_v51 }
  0x54   : > { %v338_v52 = vrot.slane %v337_v47, 2  ;;  %717 = vst [vmem:[#allocation1] ss:$4 sm:$0xff] %v329_v56 }
  0x56   : > { %1005 = vmatpush.bf16.msra.mxu0 %v1567_v53  ;;  %v344_v53 = vsel %vm328_vm9, %v343_v49, %v342_v48  ;;  %719 = vst [vmem:[#allocation1 + $0x1] ss:$4 sm:$0xff] %v338_v52 }
  0x57   : > { %1041 = vmatpush.bf16.msrb.mxu1 %v1627_v1  ;;  %v345_v57 = vrot.slane %v344_v53, 4 }
  0x59   : > { %721 = vst [vmem:[#allocation1 + $0x2] ss:$4 sm:$0xff] %v345_v57 }
  0x5a   : > { %1006 = vmatpush.bf16.msra.mxu0 %v1539_v0 }
  0x5b   : > { %1042 = vmatpush.bf16.msrb.mxu1 %v1599_v7 }
  0x5c   : > { %902 = vmatmul.bf16.gmra.mxu1 %v2068_v19  ;;  %1661 = vmatmul.msk.bf16.gmra.mxu3 %vm808_vm4, %v2066_v18 }
  0x5d   : > { %940 = vmatmul.bf16.gmra.mxu0 %v2068_v19 }
  0x5e   : > { %1007 = vmatpush.bf16.msra.mxu0 %v1511_v6  ;;  %1663 = vmatmul.msk.bf16.gmra.mxu2 %vm808_vm4, %v2066_v18 }
  0x5f   : > { %1043 = vmatpush.bf16.msrb.mxu1 %v1571_v13 }
  0x62   : > { %1008 = vmatpush.bf16.msra.mxu0 %v1483_v12 }
  0x63   : > { %1044 = vmatpush.bf16.msrb.mxu1 %v1543_v21  ;;  %v322_v21 = vrot.slane %v263_v16, 6 }
  0x65   : > { %v339_v23 = vsel %vm332_vm7, %v262_v17, %v322_v21  ;;  %v346_v24 = vsel %vm326_vm6, %v262_v17, %v322_v21  ;;  %v353_v25 = vsel %vm334_vm8, %v322_v21, %v262_v17  ;;  %v330_v28 = vsel %vm324_vm5, %v262_v17, %v322_v21 }
  0x66   : > { %1009 = vmatpush.bf16.msra.mxu0 %v1455_v20  ;;  %v264_v20 = vperm.slane %v2253_v37, 6 }
  0x67   : > { %1045 = vmatpush.bf16.msrb.mxu1 %v1515_v27 }
  0x68   : > { %v323_v22 = vrot.slane %v264_v20, 4 }
  0x6a   : > { %1010 = vmatpush.bf16.msra.mxu0 %v1427_v26  ;;  %v340_v29 = vsel %vm336_vm10, %v339_v23, %v323_v22  ;;  %v2321_v31 = vsel %vm336_vm10, %v323_v22, %v353_v25 }
  0x6b   : > { %1046 = vmatpush.bf16.msrb.mxu1 %v1487_v30  ;;  %v347_v30 = vsel %vm328_vm9, %v323_v22, %v346_v24  ;;  %v2328_v34 = vrot.slane %v340_v29, 2  ;;  %v355_v37 = vrot.slane %v2321_v31, 6 }
  0x6c   : > { %973 = vmatmul.bf16.vlgmr.msra.gmra.mxu1 %v2011_v55  ;;  %1664 = vmatmul.msk.bf16.vlgmr.msra.gmra.mxu3 %vm808_vm4, %v2009_v54  ;;  %v2330_v35 = vrot.slane %v347_v30, 4 }
  0x6d   : > { %1011 = vmatmul.bf16.vlgmr.msra.gmra.mxu0 %v2011_v55  ;;  %727 = vst [vmem:[#allocation1 + $0x21] ss:$4 sm:$0xff] %v2328_v34 }
  0x6e   : > { %1666 = vmatmul.msk.bf16.vlgmr.msra.gmra.mxu2 %vm808_vm4, %v2009_v54  ;;  %729 = vst [vmem:[#allocation1 + $0x22] ss:$4 sm:$0xff] %v2330_v35 }
  0x6f   : > { %1047 = vmatpush.bf16.msrb.mxu1 %v1459_v33  ;;  %v2326_v33 = vsel %vm328_vm9, %v330_v28, %v323_v22  ;;  %731 = vst [vmem:[#allocation1 + $0x23] ss:$4 sm:$0xff] %v355_v37 }
  0x70   : > { %725 = vst [vmem:[#allocation1 + $0x20] ss:$4 sm:$0xff] %v2326_v33 }
  0x73   : > { %1048 = vmatpush.bf16.msrb.mxu1 %v1431_v36 }
  0x77   : > { %v2346_v46 = vld.sshfl [vmem:[#allocation1 + $0x20] sm:$0xff pattern:$0x73625140]  ;;  %v2348_v47 = vld.sshfl [vmem:[#allocation1 + $0x28] sm:$0xff pattern:$0x73625140] }
  0x78   : > { %v2351_v49 = vld.sshfl [vmem:[#allocation1 + $0x30] sm:$0xff pattern:$0x73625140] }
  0x79   : > { %743 = vst [vmem:[#allocation1 + $0x20] ss:$4 sm:$0xff] %v2326_v33 }
  0x7a   : > { %744 = vst [vmem:[#allocation1 + $0x21] ss:$4 sm:$0xff] %v2328_v34 }
  0x7b   : > { %745 = vst [vmem:[#allocation1 + $0x22] ss:$4 sm:$0xff] %v2330_v35 }
  0x7c   : > { %978 = vmatmul.bf16.gmra.mxu1 %v2068_v19  ;;  %1665 = vmatmul.msk.bf16.gmra.mxu3 %vm808_vm4, %v2066_v18  ;;  %746 = vst [vmem:[#allocation1 + $0x23] ss:$4 sm:$0xff] %v2326_v33 }
  0x7d   : > { %1016 = vmatmul.bf16.gmra.mxu0 %v2068_v19 }
  0x7e   : > { %1667 = vmatmul.msk.bf16.gmra.mxu2 %vm808_vm4, %v2066_v18 }
  0x8c   : > { %1049 = vmatmul.bf16.vlgmr.msrb.gmra.mxu1 %v2011_v55  ;;  %1668 = vmatmul.msk.bf16.vlgmr.msrb.gmra.mxu3 %vm808_vm4, %v2009_v54  ;;  %v349_v55 = vsel %vm334_vm8, %v319_v42, %v258_v41  ;;  %v350_v54 = vsel %vm332_vm7, %v320_v43, %v321_v44 }
  0x8d   : > { %v351_v58 = vsel %vm336_vm10, %v350_v54, %v349_v55 }
  0x8e   : > { %v352_v59 = vrot.slane %v351_v58, 6 }
  0x90   : > { %723 = vst [vmem:[#allocation1 + $0x3] ss:$4 sm:$0xff] %v352_v59 }
  0x97   : > { %v2274_v60 = vld.sshfl [vmem:[#allocation1] sm:$0xff pattern:$0x73625140]  ;;  %v733_v61 = vld.sshfl [vmem:[#allocation1 + $0x8] sm:$0xff pattern:$0x73625140] }
  0x98   : > { %v2276_v62 = vld.sshfl [vmem:[#allocation1 + $0x10] sm:$0xff pattern:$0x73625140]  ;;  %v2278_v63 = vld.sshfl [vmem:[#allocation1 + $0x18] sm:$0xff pattern:$0x73625140] }
  0x99   : > { %739 = vst [vmem:[#allocation1] ss:$4 sm:$0xff] %v329_v56 }
  0x9a   : > { %740 = vst [vmem:[#allocation1 + $0x1] ss:$4 sm:$0xff] %v338_v52 }
  0x9b   : > { %741 = vst [vmem:[#allocation1 + $0x2] ss:$4 sm:$0xff] %v345_v57 }
  0x9c   : > { %1054 = vmatmul.bf16.gmra.mxu1 %v2068_v19  ;;  %1669 = vmatmul.msk.bf16.gmra.mxu3 %vm808_vm4, %v2066_v18  ;;  %742 = vst [vmem:[#allocation1 + $0x3] ss:$4 sm:$0xff] %v329_v56 }
  0xa3   : > { %v2283_v0 = vld.sshfl [vmem:[#allocation1] sm:$0xff pattern:$0x73625140]  ;;  %v2285_v1 = vld.sshfl [vmem:[#allocation1 + $0x8] sm:$0xff pattern:$0x73625140] }
  0xa4   : > { %v2287_v2 = vld.sshfl [vmem:[#allocation1 + $0x10] sm:$0xff pattern:$0x73625140]  ;;  %v2289_v3 = vld.sshfl [vmem:[#allocation1 + $0x18] sm:$0xff pattern:$0x73625140] }
  0xa5   : > { %754 = vst [vmem:[#allocation1] ss:$4 sm:$0xff] %v338_v52 }
  0xa6   : > { %755 = vst [vmem:[#allocation1 + $0x1] ss:$4 sm:$0xff] %v345_v57 }
  0xa7   : > { %756 = vst [vmem:[#allocation1 + $0x2] ss:$4 sm:$0xff] %v352_v59 }
  0xa8   : > { %v841_v4 = vpop.f32.mrf.mxu1  ;;  %757 = vst [vmem:[#allocation1 + $0x3] ss:$4 sm:$0xff] %v329_v56 }
  0xaa   : > { %v822_v5 = vpop.f32.mrf.mxu0 }
  0xab   : > { %v823_v44 = vadd.f32 %v822_v5, %v2274_v60 }
  0xaf   : > { %v879_v19 = vpop.f32.mrf.mxu3  ;;  %v2293_v7 = vld.sshfl [vmem:[#allocation1] sm:$0xff pattern:$0x73625140]  ;;  %v2295_v8 = vld.sshfl [vmem:[#allocation1 + $0x8] sm:$0xff pattern:$0x73625140] }
  0xb0   : > { %v2291_v18 = vpop.f32.mrf.mxu1  ;;  %v2299_v10 = vld.sshfl [vmem:[#allocation1 + $0x10] sm:$0xff pattern:$0x73625140]  ;;  %v2301_v11 = vld.sshfl [vmem:[#allocation1 + $0x18] sm:$0xff pattern:$0x73625140] }
  0xb1   : > { %v860_v6 = vpop.f32.mrf.mxu2  ;;  %769 = vst [vmem:[#allocation1] ss:$4 sm:$0xff] %v338_v52  ;;  %v842_v52 = vadd.f32 %v841_v4, %v823_v44 }
  0xb2   : > { %v2297_v9 = vpop.f32.mrf.mxu0  ;;  %770 = vst [vmem:[#allocation1 + $0x1] ss:$4 sm:$0xff] %v345_v57  ;;  %v861_v38 = vadd.f32 %v860_v6, %v733_v61 }
  0xb4   : > { %v880_v42 = vadd.f32 %v879_v19, %v861_v38  ;;  %v825_v38 = vadd.f32 %v2297_v9, %v2283_v0 }
  0xb6   : > { %v1107_v50 = vrot.slane %v880_v42, 6  ;;  %v844_v0 = vadd.f32 %v2291_v18, %v825_v38 }
  0xb7   : > { %v881_v12 = vpop.f32.mrf.mxu3 }
  0xb8   : > { %v1127_v58 = vsel %vm324_vm5, %v842_v52, %v1107_v50  ;;  %v1132_v60 = vsel %vm332_vm7, %v842_v52, %v1107_v50  ;;  %v1139_v61 = vsel %vm326_vm6, %v842_v52, %v1107_v50  ;;  %v1146_v4 = vsel %vm334_vm8, %v1107_v50, %v842_v52  ;;  %v2384_v52 = vld.sshfl [vmem:[#allocation1 + $0x28] sm:$0xff pattern:$0x73625140] }
  0xb9   : > { %v862_v13 = vpop.f32.mrf.mxu2  ;;  %v2303_v14 = vpop.f32.mrf.mxu1  ;;  %v2363_v19 = vld.sshfl [vmem:[#allocation1 + $0x10] sm:$0xff pattern:$0x73625140]  ;;  %v2372_v22 = vld.sshfl [vmem:[#allocation1] sm:$0xff pattern:$0x73625140] }
  0xba   : > { %v2305_v15 = vpop.f32.mrf.mxu0  ;;  %v863_v53 = vadd.f32 %v862_v13, %v2285_v1  ;;  %v2366_v13 = vld.sshfl [vmem:[#allocation1 + $0x18] sm:$0xff pattern:$0x73625140]  ;;  %v2374_v23 = vld.sshfl [vmem:[#allocation1 + $0x8] sm:$0xff pattern:$0x73625140] }
  0xbc   : > { %v882_v1 = vadd.f32 %v881_v12, %v863_v53 }
  0xbf   : > { %v2313_v26 = vpop.f32.mrf.mxu3 }
  0xc1   : > { %v2315_v27 = vpop.f32.mrf.mxu2  ;;  %v2323_v32 = vpop.f32.mrf.mxu1 }
  0xc2   : > { %v2332_v36 = vpop.f32.mrf.mxu0  ;;  %v866_v9 = vadd.f32 %v2315_v27, %v2295_v8 }
  0xc7   : > { %v2340_v39 = vpop.f32.mrf.mxu3 }
  0xc9   : > { %v2342_v40 = vpop.f32.mrf.mxu2  ;;  %v898_v41 = vpop.f32.mrf.mxu1 }
  0xca   : > { %v936_v43 = vpop.f32.mrf.mxu0  ;;  %v899_v45 = vadd.f32 %v898_v41, %v2276_v62 }
  0xcb   : > { %v937_v48 = vadd.f32 %v936_v43, %v2278_v63  ;;  %v1112_v43 = vrot.slane %v882_v1, 6  ;;  %v828_v1 = vadd.f32 %v2305_v15, %v2293_v7 }
  0xcd   : > { %v1165_v18 = vsel %vm326_vm6, %v844_v0, %v1112_v43 }
  0xcf   : > { %v917_v51 = vpop.f32.mrf.mxu3 }
  0xd0   : > { %v918_v56 = vadd.f32 %v917_v51, %v899_v45 }
  0xd1   : > { %v955_v57 = vpop.f32.mrf.mxu2  ;;  %v900_v55 = vpop.f32.mrf.mxu1 }
  0xd2   : > { %v956_v54 = vadd.f32 %v955_v57, %v937_v48  ;;  %v938_v59 = vpop.f32.mrf.mxu0  ;;  %v1108_v62 = vrot.slane %v918_v56, 4  ;;  %v901_v5 = vadd.f32 %v900_v55, %v2287_v2  ;;  %v2382_v48 = vld.sshfl [vmem:[#allocation1 + $0x20] sm:$0xff pattern:$0x73625140] }
  0xd3   : > { %v939_v6 = vadd.f32 %v938_v59, %v2289_v3  ;;  %v2386_v56 = vld.sshfl [vmem:[#allocation1 + $0x30] sm:$0xff pattern:$0x73625140]  ;;  %v1158_v59 = vsel %vm332_vm7, %v844_v0, %v1112_v43 }
  0xd4   : > { %v1109_v63 = vrot.slane %v956_v54, 2  ;;  %758 = vst [vmem:[#allocation1 + $0x20] ss:$4 sm:$0xff] %v2328_v34 }
  0xd5   : > { %759 = vst [vmem:[#allocation1 + $0x21] ss:$4 sm:$0xff] %v2330_v35 }
  0xd6   : > { %v1128_v16 = vsel %vm326_vm6, %v1108_v62, %v1109_v63  ;;  %v1133_v17 = vsel %vm334_vm8, %v1109_v63, %v1108_v62  ;;  %v1140_v20 = vsel %vm324_vm5, %v1108_v62, %v1109_v63  ;;  %v1147_v21 = vsel %vm332_vm7, %v1108_v62, %v1109_v63  ;;  %760 = vst [vmem:[#allocation1 + $0x22] ss:$4 sm:$0xff] %v355_v37 }
  0xd7   : > { %v1129_v2 = vsel %vm328_vm9, %v1127_v58, %v1128_v16  ;;  %v1134_v12 = vsel %vm336_vm10, %v1132_v60, %v1133_v17  ;;  %v1141_v3 = vsel %vm328_vm9, %v1140_v20, %v1139_v61  ;;  %v1148_v24 = vsel %vm336_vm10, %v1147_v21, %v1146_v4  ;;  %v919_v25 = vpop.f32.mrf.mxu3  ;;  %761 = vst [vmem:[#allocation1 + $0x23] ss:$4 sm:$0xff] %v2326_v33 }
  0xd8   : > { %v1135_v28 = vrot.slane %v1134_v12, 2  ;;  %v1142_v29 = vrot.slane %v1141_v3, 4  ;;  %v1149_v30 = vrot.slane %v1148_v24, 6  ;;  %1217 = vst [vmem:[#allocation1] ss:$4 sm:$0xff] %v1129_v2  ;;  %v920_v41 = vadd.f32 %v919_v25, %v901_v5 }
  0xd9   : > { %v957_v42 = vpop.f32.mrf.mxu2  ;;  %v903_v44 = vpop.f32.mrf.mxu1  ;;  %v1153_v33 = vsel %vm324_vm5, %v844_v0, %v1112_v43  ;;  %v847_v12 = vadd.f32 %v2303_v14, %v828_v1 }
  0xda   : > { %v958_v45 = vadd.f32 %v957_v42, %v939_v6  ;;  %1219 = vst [vmem:[#allocation1 + $0x1] ss:$4 sm:$0xff] %v1135_v28  ;;  %v1113_v50 = vrot.slane %v920_v41, 4  ;;  %v941_v51 = vpop.f32.mrf.mxu0  ;;  %v904_v57 = vadd.f32 %v903_v44, %v2299_v10 }
  0xdb   : > { %1221 = vst [vmem:[#allocation1 + $0x2] ss:$4 sm:$0xff] %v1142_v29  ;;  %v942_v58 = vadd.f32 %v941_v51, %v2301_v11  ;;  %v885_v11 = vadd.f32 %v2313_v26, %v866_v9  ;;  %v1172_v29 = vsel %vm334_vm8, %v1112_v43, %v844_v0 }
  0xdc   : > { %v1114_v53 = vrot.slane %v958_v45, 2  ;;  %1223 = vst [vmem:[#allocation1 + $0x3] ss:$4 sm:$0xff] %v1149_v30 }
  0xdd   : > { %v1117_v21 = vrot.slane %v885_v11, 6  ;;  %v830_v11 = vadd.f32 %v2332_v36, %v2372_v22 }
  0xde   : > { %v1159_v55 = vsel %vm334_vm8, %v1114_v53, %v1113_v50  ;;  %v1166_v54 = vsel %vm324_vm5, %v1113_v50, %v1114_v53  ;;  %v1154_v61 = vsel %vm326_vm6, %v1113_v50, %v1114_v53  ;;  %v1173_v3 = vsel %vm332_vm7, %v1113_v50, %v1114_v53  ;;  %v2421_v25 = vld.sshfl [vmem:[#allocation1 + $0x20] sm:$0xff pattern:$0x73625140]  ;;  %v2424_v28 = vld.sshfl [vmem:[#allocation1 + $0x28] sm:$0xff pattern:$0x73625140] }
  0xdf   : > { %v922_v8 = vpop.f32.mrf.mxu3  ;;  %v1160_v27 = vsel %vm336_vm10, %v1158_v59, %v1159_v55  ;;  %v1167_v10 = vsel %vm328_vm9, %v1166_v54, %v1165_v18  ;;  %v1155_v17 = vsel %vm328_vm9, %v1153_v33, %v1154_v61  ;;  %v1184_v30 = vsel %vm332_vm7, %v847_v12, %v1117_v21  ;;  %v2432_v42 = vld.sshfl [vmem:[#allocation1 + $0x30] sm:$0xff pattern:$0x73625140] }
  0xe0   : > { %v923_v31 = vadd.f32 %v922_v8, %v904_v57  ;;  %v1161_v63 = vrot.slane %v1160_v27, 2  ;;  %v1168_v5 = vrot.slane %v1167_v10, 4  ;;  %v1191_v14 = vsel %vm326_vm6, %v847_v12, %v1117_v21  ;;  %771 = vst [vmem:[#allocation1 + $0x20] ss:$4 sm:$0xff] %v2328_v34 }
  0xe1   : > { %v960_v60 = vpop.f32.mrf.mxu2  ;;  %v905_v37 = vpop.f32.mrf.mxu1  ;;  %v1174_v44 = vsel %vm336_vm10, %v1173_v3, %v1172_v29  ;;  %772 = vst [vmem:[#allocation1 + $0x21] ss:$4 sm:$0xff] %v2330_v35  ;;  %v868_v55 = vadd.f32 %v2342_v40, %v2374_v23  ;;  %v1179_v59 = vsel %vm324_vm5, %v847_v12, %v1117_v21 }
  0xe2   : > { %v961_v62 = vadd.f32 %v960_v60, %v942_v58  ;;  %v1118_v2 = vrot.slane %v923_v31, 4  ;;  %v943_v41 = vpop.f32.mrf.mxu0  ;;  %v1175_v51 = vrot.slane %v1174_v44, 6  ;;  %v906_v35 = vadd.f32 %v905_v37, %v2363_v19 }
  0xe3   : > { %v1232_v4 = vld.sshfl [vmem:[#allocation1] sm:$0xff pattern:$0x73625140]  ;;  %v1233_v16 = vld.sshfl [vmem:[#allocation1 + $0x8] sm:$0xff pattern:$0x73625140]  ;;  %v944_v43 = vadd.f32 %v943_v41, %v2366_v13  ;;  %v887_v40 = vadd.f32 %v2340_v39, %v868_v55  ;;  %v1198_v31 = vsel %vm334_vm8, %v1117_v21, %v847_v12 }
  0xe4   : > { %v1119_v6 = vrot.slane %v961_v62, 2  ;;  %1308 = vst [vmem:[%s2408_s24] sm:$0xff] %v1232_v4  ;;  %v1234_v26 = vld.sshfl [vmem:[#allocation1 + $0x10] sm:$0xff pattern:$0x73625140] }
  0xe5   : > { %v1235_v20 = vld.sshfl [vmem:[#allocation1 + $0x18] sm:$0xff pattern:$0x73625140]  ;;  %1309 = vst [vmem:[%s2408_s24 + $0x8] sm:$0xff] %v1233_v16  ;;  %v1122_v37 = vrot.slane %v887_v40, 6 }
  0xe6   : > { %1239 = vst [vmem:[#allocation1] ss:$4 sm:$0xff] %v1155_v17  ;;  %v1185_v7 = vsel %vm334_vm8, %v1119_v6, %v1118_v2  ;;  %v1192_v15 = vsel %vm324_vm5, %v1118_v2, %v1119_v6  ;;  %v1180_v53 = vsel %vm326_vm6, %v1118_v2, %v1119_v6  ;;  %v1199_v60 = vsel %vm332_vm7, %v1118_v2, %v1119_v6 }
  0xe7   : > { %1240 = vst [vmem:[#allocation1 + $0x1] ss:$4 sm:$0xff] %v1161_v63  ;;  %v924_v24 = vpop.f32.mrf.mxu3  ;;  %v1186_v45 = vsel %vm336_vm10, %v1184_v30, %v1185_v7  ;;  %v1193_v50 = vsel %vm328_vm9, %v1192_v15, %v1191_v14  ;;  %v1181_v8 = vsel %vm328_vm9, %v1179_v59, %v1180_v53  ;;  %v1200_v62 = vsel %vm336_vm10, %v1199_v60, %v1198_v31 }
  0xe8   : > { %1241 = vst [vmem:[#allocation1 + $0x2] ss:$4 sm:$0xff] %v1168_v5  ;;  %v1187_v0 = vrot.slane %v1186_v45, 2  ;;  %v1194_v9 = vrot.slane %v1193_v50, 4  ;;  %v925_v23 = vadd.f32 %v924_v24, %v906_v35  ;;  %v849_v63 = vadd.f32 %v2323_v32, %v830_v11 }
  0xe9   : > { %v2429_v38 = vpop.f32.mrf.mxu1  ;;  %1310 = vst [vmem:[%s2408_s24 + $0x10] sm:$0xff] %v1234_v26  ;;  %v962_v57 = vpop.f32.mrf.mxu2  ;;  %v1201_v22 = vrot.slane %v1200_v62, 6  ;;  %v2498_v35 = vld.sshfl [vmem:[#allocation1 + $0x20] sm:$0xff pattern:$0x73625140] }
  0xea   : > { %1311 = vst [vmem:[%s2408_s24 + $0x18] sm:$0xff] %v1235_v20  ;;  %v963_v27 = vadd.f32 %v962_v57, %v944_v43  ;;  %v1123_v61 = vrot.slane %v925_v23, 4  ;;  %v1210_v33 = vsel %vm332_vm7, %v849_v63, %v1122_v37  ;;  %v1205_v20 = vsel %vm324_vm5, %v849_v63, %v1122_v37  ;;  %v1012_v3 = vpop.f32.mrf.mxu0  ;;  %v778_v40 = vld.sshfl [vmem:[#allocation1 + $0x28] sm:$0xff pattern:$0x73625140] }
  0xeb   : > { %v1013_v24 = vadd.f32 %v1012_v3, %v2348_v47  ;;  %v975_v50 = vadd.f32 %v2429_v38, %v2346_v46 }
  0xec   : > { %v1124_v19 = vrot.slane %v963_v27, 2 }
  0xee   : > { %v1211_v36 = vsel %vm334_vm8, %v1124_v19, %v1123_v61  ;;  %v1206_v26 = vsel %vm326_vm6, %v1123_v61, %v1124_v19 }
  0xef   : > { %v1245_v54 = vld.sshfl [vmem:[#allocation1] sm:$0xff pattern:$0x73625140]  ;;  %v1246_v58 = vld.sshfl [vmem:[#allocation1 + $0x8] sm:$0xff pattern:$0x73625140]  ;;  %v2445_v18 = vpop.f32.mrf.mxu3  ;;  %v1212_v17 = vsel %vm336_vm10, %v1210_v33, %v1211_v36  ;;  %v1207_v2 = vsel %vm328_vm9, %v1205_v20, %v1206_v26 }
  0xf0   : > { %v1247_v34 = vld.sshfl [vmem:[#allocation1 + $0x10] sm:$0xff pattern:$0x73625140]  ;;  %v1248_v13 = vld.sshfl [vmem:[#allocation1 + $0x18] sm:$0xff pattern:$0x73625140] }
  0xf1   : > { %1252 = vst [vmem:[#allocation1] ss:$4 sm:$0xff] %v1175_v51  ;;  %v2449_v10 = vpop.f32.mrf.mxu1  ;;  %v1213_v32 = vrot.slane %v1212_v17, 2  ;;  %v1031_v7 = vpop.f32.mrf.mxu2 }
  0xf2   : > { %1253 = vst [vmem:[#allocation1 + $0x1] ss:$4 sm:$0xff] %v1181_v8  ;;  %v1032_v44 = vadd.f32 %v1031_v7, %v1013_v24  ;;  %v1014_v43 = vpop.f32.mrf.mxu0  ;;  %v977_v31 = vadd.f32 %v2449_v10, %v2382_v48 }
  0xf3   : > { %1254 = vst [vmem:[#allocation1 + $0x2] ss:$4 sm:$0xff] %v1187_v0  ;;  %v1015_v53 = vadd.f32 %v1014_v43, %v2384_v52 }
  0xf4   : > { %1255 = vst [vmem:[#allocation1 + $0x3] ss:$4 sm:$0xff] %v1194_v9  ;;  %v1110_v47 = vrot.slane %v1032_v44, 6  ;;  %v994_v9 = vadd.f32 %v2445_v18, %v975_v50 }
  0xf5   : > { %1315 = vst [vmem:[%s2408_s24 + $0x38] sm:$0x3f] %v1245_v54 }
  0xf6   : > { %1316 = vst [vmem:[%s2408_s24 + $0x40] sm:$0x3f] %v1246_v58  ;;  %v1130_v58 = vsel %vm324_vm5, %v994_v9, %v1110_v47  ;;  %v1136_v46 = vsel %vm332_vm7, %v994_v9, %v1110_v47  ;;  %v1150_v38 = vsel %vm334_vm8, %v1110_v47, %v994_v9 }
  0xf7   : > { %1317 = vst [vmem:[%s2408_s24 + $0x48] sm:$0x3f] %v1247_v34  ;;  %v2461_v39 = vpop.f32.mrf.mxu3  ;;  %v2493_v34 = vld.sshfl [vmem:[#allocation1 + $0x30] sm:$0xff pattern:$0x73625140] }
  0xf8   : > { %1318 = vst [vmem:[%s2408_s24 + $0x50] sm:$0x3f] %v1248_v13  ;;  %v996_v36 = vadd.f32 %v2461_v39, %v977_v31 }
  0xf9   : > { %v2465_v4 = vpop.f32.mrf.mxu1  ;;  %v1033_v57 = vpop.f32.mrf.mxu2 }
  0xfa   : > { %v1034_v13 = vadd.f32 %v1033_v57, %v1015_v53  ;;  %v1017_v61 = vpop.f32.mrf.mxu0 }
  0xfb   : > { %v1260_v1 = vld.sshfl [vmem:[#allocation1] sm:$0xff pattern:$0x73625140]  ;;  %v1261_v5 = vld.sshfl [vmem:[#allocation1 + $0x8] sm:$0xff pattern:$0x73625140] }
  0xfc   : > { %v1262_v6 = vld.sshfl [vmem:[#allocation1 + $0x10] sm:$0xff pattern:$0x73625140]  ;;  %v1263_v16 = vld.sshfl [vmem:[#allocation1 + $0x18] sm:$0xff pattern:$0x73625140] }
  0xfd   : > { %1267 = vst [vmem:[#allocation1] ss:$4 sm:$0xff] %v1201_v22  ;;  %v1115_v37 = vrot.slane %v1034_v13, 6  ;;  %v1018_v22 = vadd.f32 %v1017_v61, %v2424_v28  ;;  %v980_v28 = vadd.f32 %v2465_v4, %v2421_v25 }
  0xfe   : > { %1322 = vst [vmem:[%s2408_s24 + $0x70] sm:$0xff] %v1260_v1 }
  0xff   : > { %1323 = vst [vmem:[%s2408_s24 + $0x78] sm:$0xff] %v1261_v5  ;;  %v2474_v21 = vpop.f32.mrf.mxu3  ;;  %v1162_v1 = vsel %vm332_vm7, %v996_v36, %v1115_v37  ;;  %v1169_v5 = vsel %vm326_vm6, %v996_v36, %v1115_v37  ;;  %v1156_v20 = vsel %vm324_vm5, %v996_v36, %v1115_v37  ;;  %v1176_v25 = vsel %vm334_vm8, %v1115_v37, %v996_v36 }
 0x100   : > { %1324 = vst [vmem:[%s2408_s24 + $0x80] sm:$0xff] %v1262_v6 }
 0x101   : > { %1325 = vst [vmem:[%s2408_s24 + $0x88] sm:$0xff] %v1263_v16  ;;  %v2478_v12 = vpop.f32.mrf.mxu1 }
 0x102   : > { %1268 = vst [vmem:[#allocation1 + $0x1] ss:$4 sm:$0xff] %v1207_v2 }
 0x103   : > { %1269 = vst [vmem:[#allocation1 + $0x2] ss:$4 sm:$0xff] %v1213_v32 }
 0x107   : > { %v2481_v15 = vpop.f32.mrf.mxu3 }
 0x109   : > { %v1050_v14 = vpop.f32.mrf.mxu1 }
 0x10a   : > { %v1273_v29 = vld.sshfl [vmem:[#allocation1] sm:$0xff pattern:$0x73625140]  ;;  %v1274_v30 = vld.sshfl [vmem:[#allocation1 + $0x8] sm:$0xff pattern:$0x73625140]  ;;  %v1051_v51 = vadd.f32 %v1050_v14, %v2351_v49  ;;  %v1143_v49 = vsel %vm326_vm6, %v994_v9, %v1110_v47  ;;  %v999_v14 = vadd.f32 %v2474_v21, %v980_v28 }
 0x10b   : > { %v1275_v41 = vld.sshfl [vmem:[#allocation1 + $0x10] sm:$0xff pattern:$0x73625140]  ;;  %v1276_v45 = vld.sshfl [vmem:[#allocation1 + $0x18] sm:$0xff pattern:$0x73625140] }
 0x10c   : > { %1329 = vst [vmem:[%s2408_s24 + $0xa8] sm:$0x3f] %v1273_v29 }
 0x10d   : > { %1330 = vst [vmem:[%s2408_s24 + $0xb0] sm:$0x3f] %v1274_v30 }
 0x10e   : > { %1331 = vst [vmem:[%s2408_s24 + $0xb8] sm:$0x3f] %v1275_v41  ;;  %v1019_v41 = vpop.f32.mrf.mxu0 }
 0x10f   : > { %1332 = vst [vmem:[%s2408_s24 + $0xc0] sm:$0x3f] %v1276_v45  ;;  %v1069_v0 = vpop.f32.mrf.mxu3  ;;  %v1020_v43 = vadd.f32 %v1019_v41, %v778_v40 }
 0x110   : > { %v1070_v55 = vadd.f32 %v1069_v0, %v1051_v51 }
 0x111   : > { %v1052_v54 = vpop.f32.mrf.mxu1 }
 0x112   : > { %v1111_v59 = vrot.slane %v1070_v55, 4  ;;  %v1053_v19 = vadd.f32 %v1052_v54, %v2386_v56  ;;  %v1036_v56 = vpop.f32.mrf.mxu2 }
 0x113   : > { %v1037_v17 = vadd.f32 %v1036_v56, %v1018_v22 }
 0x114   : > { %v1131_v52 = vsel %vm328_vm9, %v1130_v58, %v1111_v59  ;;  %v1137_v18 = vsel %vm336_vm10, %v1136_v46, %v1111_v59  ;;  %v1144_v8 = vsel %vm328_vm9, %v1111_v59, %v1143_v49  ;;  %v1151_v27 = vsel %vm336_vm10, %v1111_v59, %v1150_v38 }
 0x115   : > { %v1138_v23 = vrot.slane %v1137_v18, 2  ;;  %v1145_v60 = vrot.slane %v1144_v8, 4  ;;  %v1152_v11 = vrot.slane %v1151_v27, 6  ;;  %1225 = vst [vmem:[#allocation1 + $0x20] ss:$4 sm:$0xff] %v1131_v52  ;;  %v1120_v30 = vrot.slane %v1037_v17, 6 }
 0x116   : > { %v982_v52 = vadd.f32 %v2478_v12, %v2498_v35 }
 0x117   : > { %v1071_v62 = vpop.f32.mrf.mxu3  ;;  %1227 = vst [vmem:[#allocation1 + $0x21] ss:$4 sm:$0xff] %v1138_v23  ;;  %v1188_v4 = vsel %vm332_vm7, %v999_v14, %v1120_v30  ;;  %v1195_v50 = vsel %vm326_vm6, %v999_v14, %v1120_v30  ;;  %v1182_v54 = vsel %vm324_vm5, %v999_v14, %v1120_v30  ;;  %v1202_v8 = vsel %vm334_vm8, %v1120_v30, %v999_v14 }
 0x118   : > { %v1072_v63 = vadd.f32 %v1071_v62, %v1053_v19  ;;  %1229 = vst [vmem:[#allocation1 + $0x22] ss:$4 sm:$0xff] %v1145_v60  ;;  %v1001_v27 = vadd.f32 %v2481_v15, %v982_v52 }
 0x119   : > { %1231 = vst [vmem:[#allocation1 + $0x23] ss:$4 sm:$0xff] %v1152_v11  ;;  %v1055_v6 = vpop.f32.mrf.mxu1 }
 0x11a   : > { %v1116_v33 = vrot.slane %v1072_v63, 4  ;;  %v1056_v16 = vadd.f32 %v1055_v6, %v2432_v42  ;;  %v1038_v21 = vpop.f32.mrf.mxu2 }
 0x11b   : > { %v1039_v49 = vadd.f32 %v1038_v21, %v1020_v43 }
 0x11c   : > { %v1163_v48 = vsel %vm336_vm10, %v1162_v1, %v1116_v33  ;;  %v1170_v10 = vsel %vm328_vm9, %v1116_v33, %v1169_v5  ;;  %v1157_v7 = vsel %vm328_vm9, %v1156_v20, %v1116_v33  ;;  %v1177_v44 = vsel %vm336_vm10, %v1116_v33, %v1176_v25 }
 0x11d   : > { %v1164_v26 = vrot.slane %v1163_v48, 2  ;;  %v1171_v39 = vrot.slane %v1170_v10, 4  ;;  %v1178_v53 = vrot.slane %v1177_v44, 6  ;;  %v1125_v18 = vrot.slane %v1039_v49, 6 }
 0x11f   : > { %v1074_v32 = vpop.f32.mrf.mxu3  ;;  %v1214_v23 = vsel %vm332_vm7, %v1001_v27, %v1125_v18  ;;  %v1208_v37 = vsel %vm324_vm5, %v1001_v27, %v1125_v18 }
 0x120   : > { %v1075_v2 = vadd.f32 %v1074_v32, %v1056_v16  ;;  %v1236_v3 = vld.sshfl [vmem:[#allocation1 + $0x20] sm:$0xff pattern:$0x73625140]  ;;  %v1237_v24 = vld.sshfl [vmem:[#allocation1 + $0x28] sm:$0xff pattern:$0x73625140] }
 0x121   : > { %v1238_v29 = vld.sshfl [vmem:[#allocation1 + $0x30] sm:$0xff pattern:$0x73625140]  ;;  %1312 = vst [vmem:[%s2408_s24 + $0x20] sm:$0xff] %v1236_v3  ;;  %v1057_v47 = vpop.f32.mrf.mxu1 }
 0x122   : > { %1242 = vst [vmem:[#allocation1 + $0x20] ss:$4 sm:$0xff] %v1157_v7  ;;  %v1121_v42 = vrot.slane %v1075_v2, 4  ;;  %v1058_v59 = vadd.f32 %v1057_v47, %v2493_v34 }
 0x123   : > { %1243 = vst [vmem:[#allocation1 + $0x21] ss:$4 sm:$0xff] %v1164_v26 }
 0x124   : > { %1244 = vst [vmem:[#allocation1 + $0x22] ss:$4 sm:$0xff] %v1171_v39  ;;  %v1189_v45 = vsel %vm336_vm10, %v1188_v4, %v1121_v42  ;;  %v1196_v51 = vsel %vm328_vm9, %v1121_v42, %v1195_v50  ;;  %v1183_v38 = vsel %vm328_vm9, %v1182_v54, %v1121_v42  ;;  %v1203_v40 = vsel %vm336_vm10, %v1121_v42, %v1202_v8 }
 0x125   : > { %1313 = vst [vmem:[%s2408_s24 + $0x28] sm:$0xff] %v1237_v24  ;;  %v1190_v0 = vrot.slane %v1189_v45, 2  ;;  %v1197_v58 = vrot.slane %v1196_v51, 4  ;;  %v1204_v60 = vrot.slane %v1203_v40, 6 }
 0x126   : > { %1314 = vst [vmem:[%s2408_s24 + $0x30] sm:$0xff] %v1238_v29 }
 0x127   : > { %v1076_v55 = vpop.f32.mrf.mxu3 }
 0x128   : > { %v1077_v13 = vadd.f32 %v1076_v55, %v1058_v59 }
 0x12a   : > { %v1126_v34 = vrot.slane %v1077_v13, 4 }
 0x12b   : > { %v1249_v9 = vld.sshfl [vmem:[#allocation1 + $0x20] sm:$0xff pattern:$0x73625140]  ;;  %v1250_v57 = vld.sshfl [vmem:[#allocation1 + $0x28] sm:$0xff pattern:$0x73625140] }
 0x12c   : > { %v1251_v46 = vld.sshfl [vmem:[#allocation1 + $0x30] sm:$0xff pattern:$0x73625140]  ;;  %1319 = vst [vmem:[%s2408_s24 + $0x58] sm:$0x3f] %v1249_v9  ;;  %v1215_v11 = vsel %vm336_vm10, %v1214_v23, %v1126_v34  ;;  %v1209_v15 = vsel %vm328_vm9, %v1208_v37, %v1126_v34 }
 0x12d   : > { %1256 = vst [vmem:[#allocation1 + $0x20] ss:$4 sm:$0xff] %v1178_v53  ;;  %v1216_v31 = vrot.slane %v1215_v11, 2 }
 0x12e   : > { %1257 = vst [vmem:[#allocation1 + $0x21] ss:$4 sm:$0xff] %v1183_v38 }
 0x12f   : > { %1258 = vst [vmem:[#allocation1 + $0x22] ss:$4 sm:$0xff] %v1190_v0 }
 0x130   : > { %1259 = vst [vmem:[#allocation1 + $0x23] ss:$4 sm:$0xff] %v1197_v58 }
 0x131   : > { %1320 = vst [vmem:[%s2408_s24 + $0x60] sm:$0x3f] %v1250_v57 }
 0x132   : > { %1321 = vst [vmem:[%s2408_s24 + $0x68] sm:$0x3f] %v1251_v46 }
 0x137   : > { %v1264_v19 = vld.sshfl [vmem:[#allocation1 + $0x20] sm:$0xff pattern:$0x73625140]  ;;  %v1265_v12 = vld.sshfl [vmem:[#allocation1 + $0x28] sm:$0xff pattern:$0x73625140] }
 0x138   : > { %v1266_v35 = vld.sshfl [vmem:[#allocation1 + $0x30] sm:$0xff pattern:$0x73625140]  ;;  %1326 = vst [vmem:[%s2408_s24 + $0x90] sm:$0xff] %v1264_v19 }
 0x139   : > { %1270 = vst [vmem:[#allocation1 + $0x20] ss:$4 sm:$0xff] %v1204_v60 }
 0x13a   : > { %1327 = vst [vmem:[%s2408_s24 + $0x98] sm:$0xff] %v1265_v12 }
 0x13b   : > { %1328 = vst [vmem:[%s2408_s24 + $0xa0] sm:$0xff] %v1266_v35 }
 0x13c   : > { %1271 = vst [vmem:[#allocation1 + $0x21] ss:$4 sm:$0xff] %v1209_v15 }
 0x13d   : > { %1272 = vst [vmem:[#allocation1 + $0x22] ss:$4 sm:$0xff] %v1216_v31 }
 0x144   : > { %v1277_v61 = vld.sshfl [vmem:[#allocation1 + $0x20] sm:$0xff pattern:$0x73625140]  ;;  %v1278_v62 = vld.sshfl [vmem:[#allocation1 + $0x28] sm:$0xff pattern:$0x73625140] }
 0x145   : > { %v1279_v63 = vld.sshfl [vmem:[#allocation1 + $0x30] sm:$0xff pattern:$0x73625140]  ;;  %1333 = vst [vmem:[%s2408_s24 + $0xc8] sm:$0x3f] %v1277_v61 }
 0x146   : > { %1334 = vst [vmem:[%s2408_s24 + $0xd0] sm:$0x3f] %v1278_v62 }
 0x147   : > { %1335 = vst [vmem:[%s2408_s24 + $0xd8] sm:$0x3f] %v1279_v63 }
 0x148 PF: > { %s13_s12 = sadd.s32 1, %s1751_s12  }
 0x149   : > { %p10_p4 = scmp.ge.s32.totalorder %s13_s12, 4  }
 0x14b   :  { %12 = sbr.rel (!%p10_p4) target bundleno = 1 (0x1), region = 83 }

</bundles_post_ra>
